<compile_context>
chip_gen: v7x
topology: tpu7x:2x2x1
jax: 0.10.0
libtpu: 0.0.40
codegen_flags: <defaults>
</compile_context>

<pallas_src>
import functools

import jax
import jax.numpy as jnp
from jax.experimental import pallas as pl
from jax.experimental.pallas import tpu as pltpu


# ---------------------------------------------------------------------------
# Fused Pallas kernel: all layers + output projection, one grid step per t.
# ---------------------------------------------------------------------------
def _encoder_kernel(x_ref, h0_ref, a_ref, wx_ref, wh_ref, b_ref,
                    wout_ref, bout_ref, out_ref, hT_ref, h_scr,
                    *, num_layers):
    """One timestep of the full ATG-GRU stack.

    x_ref   : (1, BRN, H)        bf16   current-step input (feature-padded to H)
    h0_ref  : (L, BRN, H)        f32    initial hidden (read at t == 0)
    a_ref   : (BRN, BRN)         bf16   block-diagonal adaptive adjacency
    wx_ref  : (L*6, H, H)        bf16   x-side weights  [z_I, z_A, r_I, r_A, c_I, c_A]
    wh_ref  : (L*6, H, H)        bf16   h-side weights  (same ordering)
    b_ref   : (L*3, 1, H)        f32    gate biases     [z, r, c]
    wout_ref: (H, Fp)            bf16   output projection (lane-padded)
    bout_ref: (1, Fp)            f32
    out_ref : (1, BRN, Fp)       f32    per-step output
    hT_ref  : (L, BRN, H)        f32    final hidden (written at t == T-1)
    h_scr   : VMEM (L, BRN, H)   f32    hidden state resident across steps
    """
    t = pl.program_id(0)

    @pl.when(t == 0)
    def _():
        h_scr[...] = h0_ref[...]

    A = a_ref[...]                                   # (BRN, BRN) bf16
    x = x_ref[0]                                     # (BRN, H)   bf16

    for l in range(num_layers):
        h = h_scr[l]                                 # (BRN, H) f32
        hb = h.astype(jnp.bfloat16)

        def gconv(widx, xin_b, hin_b, l=l):
            # Concat-free graph-conv: identity support + adaptive support.
            p_i = (jnp.dot(xin_b, wx_ref[l * 6 + widx],
                           preferred_element_type=jnp.float32)
                   + jnp.dot(hin_b, wh_ref[l * 6 + widx],
                             preferred_element_type=jnp.float32))
            p_a = (jnp.dot(xin_b, wx_ref[l * 6 + widx + 1],
                           preferred_element_type=jnp.float32)
                   + jnp.dot(hin_b, wh_ref[l * 6 + widx + 1],
                             preferred_element_type=jnp.float32))
            return p_i + jnp.dot(A, p_a.astype(jnp.bfloat16),
                                 preferred_element_type=jnp.float32)

        # Separate z / r weight matrices -> no lane-slice of a fused zr block.
        z = jax.nn.sigmoid(gconv(0, x, hb) + b_ref[l * 3 + 0])   # (BRN, H) f32
        r = jax.nn.sigmoid(gconv(2, x, hb) + b_ref[l * 3 + 1])
        rh = (r * h).astype(jnp.bfloat16)
        hc = jnp.tanh(gconv(4, x, rh) + b_ref[l * 3 + 2])

        # TODO(synk): blend convention (z*h + (1-z)*hc) unverified vs ATG_GRU.
        h_new = z * h + (1.0 - z) * hc
        h_scr[l] = h_new
        x = h_new.astype(jnp.bfloat16)               # input to next layer

    # Fused output projection of the top-layer hidden (lane-dense Fp columns).
    o = (jnp.dot(h_scr[num_layers - 1].astype(jnp.bfloat16), wout_ref[...],
                 preferred_element_type=jnp.float32)
         + bout_ref[...])
    out_ref[0] = o

    @pl.when(t == pl.num_programs(0) - 1)
    def _():
        hT_ref[...] = h_scr[...]


# ---------------------------------------------------------------------------
# Wrapper: layout prep (glue, once per forward) + single pallas_call.
# ---------------------------------------------------------------------------
def encoder_forward(x, h_pre, params, *, hidden, num_layers):
    B, T, N, C, R = x.shape
    # TODO(synk): general in_features > hidden path would need padding of the
    # hidden-as-input stream; typical ATGCN configs have in_features << hidden.
    assert C <= hidden, "in_features must be <= hidden_features"
    BRN = B * R * N

    # --- adaptive adjacency: BigA = I_B (x) blockdiag_r softmax(relu(E_r E_r^T))
    E = params["node_emb"]                                        # (R, N, De)
    A = jax.nn.softmax(jax.nn.relu(jnp.einsum("rnd,rmd->rnm", E, E)), axis=-1)
    blk = (jnp.eye(R, dtype=A.dtype)[:, None, :, None]
           * A[:, :, None, :]).reshape(R * N, R * N)              # blockdiag_r
    bigA = (jnp.eye(B, dtype=A.dtype)[:, None, :, None]
            * blk[None, :, None, :]).reshape(BRN, BRN).astype(jnp.bfloat16)

    # --- x -> time-major, (b, r, n) rows, features zero-padded to H, bf16
    x_t = jnp.transpose(x, (1, 0, 4, 2, 3)).reshape(T, BRN, C)
    x_t = jnp.pad(x_t, ((0, 0), (0, 0), (0, hidden - C))).astype(jnp.bfloat16)

    if h_pre is None:
        h0 = jnp.zeros((num_layers, BRN, hidden), jnp.float32)
    else:
        h0 = jnp.transpose(h_pre, (0, 1, 4, 2, 3)).reshape(
            num_layers, BRN, hidden).astype(jnp.float32)

    F = params["w_out"].shape[1]
    Fp = ((F + 127) // 128) * 128                                 # lane-dense out
    w_out = jnp.pad(params["w_out"], ((0, 0), (0, Fp - F))).astype(jnp.bfloat16)
    b_out = jnp.pad(params["b_out"], ((0, 0), (0, Fp - F))).astype(jnp.float32)

    wx = params["wx"].astype(jnp.bfloat16)                        # (L*6, H, H)
    wh = params["wh"].astype(jnp.bfloat16)                        # (L*6, H, H)
    b = params["b"].astype(jnp.float32)                           # (L*3, 1, H)

    kernel = functools.partial(_encoder_kernel, num_layers=num_layers)

    out_seq, hT = pl.pallas_call(
        kernel,
        grid=(T,),
        out_shape=(jax.ShapeDtypeStruct((T, BRN, Fp), jnp.float32),
                   jax.ShapeDtypeStruct((num_layers, BRN, hidden), jnp.float32)),
        in_specs=[
            pl.BlockSpec((1, BRN, hidden), lambda t: (t, 0, 0)),        # x_t
            pl.BlockSpec((num_layers, BRN, hidden), lambda t: (0, 0, 0)),  # h0
            pl.BlockSpec((BRN, BRN), lambda t: (0, 0)),                 # bigA
            pl.BlockSpec((num_layers * 6, hidden, hidden), lambda t: (0, 0, 0)),
            pl.BlockSpec((num_layers * 6, hidden, hidden), lambda t: (0, 0, 0)),
            pl.BlockSpec((num_layers * 3, 1, hidden), lambda t: (0, 0, 0)),
            pl.BlockSpec((hidden, Fp), lambda t: (0, 0)),               # w_out
            pl.BlockSpec((1, Fp), lambda t: (0, 0)),                    # b_out
        ],
        out_specs=(
            pl.BlockSpec((1, BRN, Fp), lambda t: (t, 0, 0)),            # out per t
            pl.BlockSpec((num_layers, BRN, hidden), lambda t: (0, 0, 0)),  # hT
        ),
        scratch_shapes=[pltpu.VMEM((num_layers, BRN, hidden), jnp.float32)],
        compiler_params=pltpu.CompilerParams(
            dimension_semantics=("arbitrary",),       # time recurrence is sequential
            vmem_limit_bytes=32 * 1024 * 1024),
    )(x_t, h0, bigA, wx, wh, b, w_out, b_out)

    # --- back to module layouts
    out = out_seq[:, :, :F].reshape(T, B, R, N, F)
    out = jnp.transpose(out, (1, 0, 3, 4, 2))            # (B, T, N, F, R)
    h_new = hT.reshape(num_layers, B, R, N, hidden)
    h_new = jnp.transpose(h_new, (0, 1, 3, 4, 2))        # (L, B, N, H, R)
    return out, h_new


# ---------------------------------------------------------------------------
# Deterministic parameter init (shapes follow the module's __init__ args)
# ---------------------------------------------------------------------------
def init_params(key, *, in_features, hidden, num_node, embeded_dim,
                num_relation, out_features, num_layers):
    keys = iter(jax.random.split(key, 2 + num_layers * 12))
    params = {}
    params["node_emb"] = 0.1 * jax.random.normal(
        next(keys), (num_relation, num_node, embeded_dim), jnp.float32)

    wx_list, wh_list, b_list = [], [], []
    for l in range(num_layers):
        c_in = in_features if l == 0 else hidden
        for _ in range(6):   # [z_I, z_A, r_I, r_A, c_I, c_A]
            w = 0.1 * jax.random.normal(next(keys), (c_in, hidden), jnp.float32)
            wx_list.append(jnp.pad(w, ((0, hidden - c_in), (0, 0))))
            wh_list.append(0.1 * jax.random.normal(
                next(keys), (hidden, hidden), jnp.float32))
        for _ in range(3):   # [z, r, c]
            b_list.append(jnp.zeros((1, hidden), jnp.float32))
    params["wx"] = jnp.stack(wx_list)                    # (L*6, H, H)
    params["wh"] = jnp.stack(wh_list)                    # (L*6, H, H)
    params["b"] = jnp.stack(b_list)                      # (L*3, 1, H)

    params["w_out"] = 0.1 * jax.random.normal(
        next(keys), (hidden, out_features), jnp.float32)
    params["b_out"] = jnp.zeros((1, out_features), jnp.float32)
    return params


# ---------------------------------------------------------------------------
# Demo
# ---------------------------------------------------------------------------
if __name__ == "__main__":
    B = 2                 # batch
    T = 8                 # timesteps
    num_node = 8          # graph nodes
    in_features = 4
    hidden_features = 32
    embeded_dim = 8
    num_relation = 2
    out_features = 4
    num_layers = 2

    key = jax.random.PRNGKey(0)
    k_param, k_x = jax.random.split(key)

    params = init_params(
        k_param,
        in_features=in_features, hidden=hidden_features, num_node=num_node,
        embeded_dim=embeded_dim, num_relation=num_relation,
        out_features=out_features, num_layers=num_layers)

    x = jax.random.normal(
        k_x, (B, T, num_node, in_features, num_relation), jnp.float32)

    # h_pre=None follows the Encoder's default initState (zeros) path.
    out, h_new = encoder_forward(x, None, params,
                                 hidden=hidden_features,
                                 num_layers=num_layers)
    jax.block_until_ready((out, h_new))

    assert out.shape == (B, T, num_node, out_features, num_relation)
    assert h_new.shape == (num_layers, B, num_node, hidden_features,
                           num_relation)
    print("KERNEL_OK")
</pallas_src>

<mosaic_0001>
module attributes {stable_mosaic.version = 11 : i64} {
  func.func @_encoder_kernel(%arg0: i32, %arg1: memref<1x32x32xbf16, #tpu.memory_space<vmem>>, %arg2: memref<2x32x32xf32, #tpu.memory_space<vmem>>, %arg3: memref<32x32xbf16, #tpu.memory_space<vmem>>, %arg4: memref<12x32x32xbf16, #tpu.memory_space<vmem>>, %arg5: memref<12x32x32xbf16, #tpu.memory_space<vmem>>, %arg6: memref<6x1x32xf32, #tpu.memory_space<vmem>>, %arg7: memref<32x128xbf16, #tpu.memory_space<vmem>>, %arg8: memref<1x128xf32, #tpu.memory_space<vmem>>, %arg9: memref<1x32x128xf32, #tpu.memory_space<vmem>>, %arg10: memref<2x32x32xf32, #tpu.memory_space<vmem>>, %arg11: memref<2x32x32xf32, #tpu.memory_space<vmem>>) attributes {dimension_semantics = [#tpu.dimension_semantics<arbitrary>], iteration_bounds = array<i64: 8>, scalar_prefetch = 0 : i64, scratch_operands = 1 : i64, tpu.core_type = #tpu.core_type<tc>, window_params = [{transform_indices = @transform_0, window_bounds = array<i64: 1, 32, 32>}, {pipeline_mode = #tpu.pipeline_mode<synchronous>, transform_indices = @transform_1, window_bounds = array<i64: 2, 32, 32>}, {pipeline_mode = #tpu.pipeline_mode<synchronous>, transform_indices = @transform_2, window_bounds = array<i64: 32, 32>}, {pipeline_mode = #tpu.pipeline_mode<synchronous>, transform_indices = @transform_3, window_bounds = array<i64: 12, 32, 32>}, {pipeline_mode = #tpu.pipeline_mode<synchronous>, transform_indices = @transform_4, window_bounds = array<i64: 12, 32, 32>}, {pipeline_mode = #tpu.pipeline_mode<synchronous>, transform_indices = @transform_5, window_bounds = array<i64: 6, 1, 32>}, {pipeline_mode = #tpu.pipeline_mode<synchronous>, transform_indices = @transform_6, window_bounds = array<i64: 32, 128>}, {pipeline_mode = #tpu.pipeline_mode<synchronous>, transform_indices = @transform_7, window_bounds = array<i64: 1, 128>}, {transform_indices = @transform_8, window_bounds = array<i64: 1, 32, 128>}, {pipeline_mode = #tpu.pipeline_mode<synchronous>, transform_indices = @transform_9, window_bounds = array<i64: 2, 32, 32>}]} {
    %c0_i32 = arith.constant 0 : i32
    %0 = arith.cmpi eq, %arg0, %c0_i32 : i32
    %1 = arith.extui %0 : i1 to i32
    %c0_i32_0 = arith.constant 0 : i32
    %2 = arith.cmpi ne, %1, %c0_i32_0 : i32
    scf.if %2 {
      %c0_143 = arith.constant 0 : index
      %c0_144 = arith.constant 0 : index
      %c0_145 = arith.constant 0 : index
      %195 = vector.load %arg2[%c0_143, %c0_144, %c0_145] : memref<2x32x32xf32, #tpu.memory_space<vmem>>, vector<2x32x32xf32>
      %c0_146 = arith.constant 0 : index
      %c0_147 = arith.constant 0 : index
      %c0_148 = arith.constant 0 : index
      %196 = vector.load %arg11[%c0_146, %c0_147, %c0_148] : memref<2x32x32xf32, #tpu.memory_space<vmem>>, vector<2x32x32xf32>
      tpu.vector_store %arg11[%c0_146, %c0_147, %c0_148], %195 {strides = array<i32>} : memref<2x32x32xf32, #tpu.memory_space<vmem>>, vector<2x32x32xf32>,
    } else {
    }
    %c0 = arith.constant 0 : index
    %c0_1 = arith.constant 0 : index
    %3 = vector.load %arg3[%c0, %c0_1] : memref<32x32xbf16, #tpu.memory_space<vmem>>, vector<32x32xbf16>
    %c0_2 = arith.constant 0 : index
    %c0_3 = arith.constant 0 : index
    %c0_4 = arith.constant 0 : index
    %4 = vector.load %arg1[%c0_2, %c0_3, %c0_4] : memref<1x32x32xbf16, #tpu.memory_space<vmem>>, vector<1x32x32xbf16>
    %5 = vector.shape_cast %4 : vector<1x32x32xbf16> to vector<32x32xbf16>
    %c0_5 = arith.constant 0 : index
    %c0_6 = arith.constant 0 : index
    %c0_7 = arith.constant 0 : index
    %6 = vector.load %arg11[%c0_5, %c0_6, %c0_7] : memref<2x32x32xf32, #tpu.memory_space<vmem>>, vector<1x32x32xf32>
    %7 = vector.shape_cast %6 : vector<1x32x32xf32> to vector<32x32xf32>
    %8 = arith.truncf %7 : vector<32x32xf32> to vector<32x32xbf16>
    %c0_8 = arith.constant 0 : index
    %c0_9 = arith.constant 0 : index
    %c0_10 = arith.constant 0 : index
    %9 = vector.load %arg4[%c0_8, %c0_9, %c0_10] : memref<12x32x32xbf16, #tpu.memory_space<vmem>>, vector<1x32x32xbf16>
    %10 = vector.shape_cast %9 : vector<1x32x32xbf16> to vector<32x32xbf16>
    %cst = arith.constant dense<0.000000e+00> : vector<32x32xf32>
    %11 = tpu.matmul %5, %10, %cst {dimension_numbers = #tpu.dot_dimension_numbers<[1], [0], [0], [1], [0, 0, 1, 1], [], []>} : vector<32x32xbf16>, vector<32x32xbf16>, vector<32x32xf32> -> vector<32x32xf32>
    %c0_11 = arith.constant 0 : index
    %c0_12 = arith.constant 0 : index
    %c0_13 = arith.constant 0 : index
    %12 = vector.load %arg5[%c0_11, %c0_12, %c0_13] : memref<12x32x32xbf16, #tpu.memory_space<vmem>>, vector<1x32x32xbf16>
    %13 = vector.shape_cast %12 : vector<1x32x32xbf16> to vector<32x32xbf16>
    %cst_14 = arith.constant dense<0.000000e+00> : vector<32x32xf32>
    %14 = tpu.matmul %8, %13, %cst_14 {dimension_numbers = #tpu.dot_dimension_numbers<[1], [0], [0], [1], [0, 0, 1, 1], [], []>} : vector<32x32xbf16>, vector<32x32xbf16>, vector<32x32xf32> -> vector<32x32xf32>
    %15 = arith.addf %11, %14 : vector<32x32xf32>
    %c1 = arith.constant 1 : index
    %c0_15 = arith.constant 0 : index
    %c0_16 = arith.constant 0 : index
    %16 = vector.load %arg4[%c1, %c0_15, %c0_16] : memref<12x32x32xbf16, #tpu.memory_space<vmem>>, vector<1x32x32xbf16>
    %17 = vector.shape_cast %16 : vector<1x32x32xbf16> to vector<32x32xbf16>
    %cst_17 = arith.constant dense<0.000000e+00> : vector<32x32xf32>
    %18 = tpu.matmul %5, %17, %cst_17 {dimension_numbers = #tpu.dot_dimension_numbers<[1], [0], [0], [1], [0, 0, 1, 1], [], []>} : vector<32x32xbf16>, vector<32x32xbf16>, vector<32x32xf32> -> vector<32x32xf32>
    %c1_18 = arith.constant 1 : index
    %c0_19 = arith.constant 0 : index
    %c0_20 = arith.constant 0 : index
    %19 = vector.load %arg5[%c1_18, %c0_19, %c0_20] : memref<12x32x32xbf16, #tpu.memory_space<vmem>>, vector<1x32x32xbf16>
    %20 = vector.shape_cast %19 : vector<1x32x32xbf16> to vector<32x32xbf16>
    %cst_21 = arith.constant dense<0.000000e+00> : vector<32x32xf32>
    %21 = tpu.matmul %8, %20, %cst_21 {dimension_numbers = #tpu.dot_dimension_numbers<[1], [0], [0], [1], [0, 0, 1, 1], [], []>} : vector<32x32xbf16>, vector<32x32xbf16>, vector<32x32xf32> -> vector<32x32xf32>
    %22 = arith.addf %18, %21 : vector<32x32xf32>
    %23 = arith.truncf %22 : vector<32x32xf32> to vector<32x32xbf16>
    %cst_22 = arith.constant dense<0.000000e+00> : vector<32x32xf32>
    %24 = tpu.matmul %3, %23, %cst_22 {dimension_numbers = #tpu.dot_dimension_numbers<[1], [0], [0], [1], [0, 0, 1, 1], [], []>} : vector<32x32xbf16>, vector<32x32xbf16>, vector<32x32xf32> -> vector<32x32xf32>
    %25 = arith.addf %15, %24 : vector<32x32xf32>
    %c0_23 = arith.constant 0 : index
    %c0_24 = arith.constant 0 : index
    %c0_25 = arith.constant 0 : index
    %26 = vector.load %arg6[%c0_23, %c0_24, %c0_25] : memref<6x1x32xf32, #tpu.memory_space<vmem>>, vector<1x1x32xf32>
    %27 = vector.shape_cast %26 : vector<1x1x32xf32> to vector<1x32xf32>
    %28 = vector.broadcast %27 : vector<1x32xf32> to vector<32x32xf32>
    %29 = arith.addf %25, %28 : vector<32x32xf32>
    %30 = arith.negf %29 : vector<32x32xf32>
    %31 = math.exp %30 : vector<32x32xf32>
    %cst_26 = arith.constant 1.000000e+00 : f32
    %32 = vector.broadcast %cst_26 : f32 to vector<32x32xf32>
    %33 = arith.addf %32, %31 : vector<32x32xf32>
    %34 = arith.divf %32, %33 : vector<32x32xf32>
    %c2 = arith.constant 2 : index
    %c0_27 = arith.constant 0 : index
    %c0_28 = arith.constant 0 : index
    %35 = vector.load %arg4[%c2, %c0_27, %c0_28] : memref<12x32x32xbf16, #tpu.memory_space<vmem>>, vector<1x32x32xbf16>
    %36 = vector.shape_cast %35 : vector<1x32x32xbf16> to vector<32x32xbf16>
    %cst_29 = arith.constant dense<0.000000e+00> : vector<32x32xf32>
    %37 = tpu.matmul %5, %36, %cst_29 {dimension_numbers = #tpu.dot_dimension_numbers<[1], [0], [0], [1], [0, 0, 1, 1], [], []>} : vector<32x32xbf16>, vector<32x32xbf16>, vector<32x32xf32> -> vector<32x32xf32>
    %c2_30 = arith.constant 2 : index
    %c0_31 = arith.constant 0 : index
    %c0_32 = arith.constant 0 : index
    %38 = vector.load %arg5[%c2_30, %c0_31, %c0_32] : memref<12x32x32xbf16, #tpu.memory_space<vmem>>, vector<1x32x32xbf16>
    %39 = vector.shape_cast %38 : vector<1x32x32xbf16> to vector<32x32xbf16>
    %cst_33 = arith.constant dense<0.000000e+00> : vector<32x32xf32>
    %40 = tpu.matmul %8, %39, %cst_33 {dimension_numbers = #tpu.dot_dimension_numbers<[1], [0], [0], [1], [0, 0, 1, 1], [], []>} : vector<32x32xbf16>, vector<32x32xbf16>, vector<32x32xf32> -> vector<32x32xf32>
    %41 = arith.addf %37, %40 : vector<32x32xf32>
    %c3 = arith.constant 3 : index
    %c0_34 = arith.constant 0 : index
    %c0_35 = arith.constant 0 : index
    %42 = vector.load %arg4[%c3, %c0_34, %c0_35] : memref<12x32x32xbf16, #tpu.memory_space<vmem>>, vector<1x32x32xbf16>
    %43 = vector.shape_cast %42 : vector<1x32x32xbf16> to vector<32x32xbf16>
    %cst_36 = arith.constant dense<0.000000e+00> : vector<32x32xf32>
    %44 = tpu.matmul %5, %43, %cst_36 {dimension_numbers = #tpu.dot_dimension_numbers<[1], [0], [0], [1], [0, 0, 1, 1], [], []>} : vector<32x32xbf16>, vector<32x32xbf16>, vector<32x32xf32> -> vector<32x32xf32>
    %c3_37 = arith.constant 3 : index
    %c0_38 = arith.constant 0 : index
    %c0_39 = arith.constant 0 : index
    %45 = vector.load %arg5[%c3_37, %c0_38, %c0_39] : memref<12x32x32xbf16, #tpu.memory_space<vmem>>, vector<1x32x32xbf16>
    %46 = vector.shape_cast %45 : vector<1x32x32xbf16> to vector<32x32xbf16>
    %cst_40 = arith.constant dense<0.000000e+00> : vector<32x32xf32>
    %47 = tpu.matmul %8, %46, %cst_40 {dimension_numbers = #tpu.dot_dimension_numbers<[1], [0], [0], [1], [0, 0, 1, 1], [], []>} : vector<32x32xbf16>, vector<32x32xbf16>, vector<32x32xf32> -> vector<32x32xf32>
    %48 = arith.addf %44, %47 : vector<32x32xf32>
    %49 = arith.truncf %48 : vector<32x32xf32> to vector<32x32xbf16>
    %cst_41 = arith.constant dense<0.000000e+00> : vector<32x32xf32>
    %50 = tpu.matmul %3, %49, %cst_41 {dimension_numbers = #tpu.dot_dimension_numbers<[1], [0], [0], [1], [0, 0, 1, 1], [], []>} : vector<32x32xbf16>, vector<32x32xbf16>, vector<32x32xf32> -> vector<32x32xf32>
    %51 = arith.addf %41, %50 : vector<32x32xf32>
    %c1_42 = arith.constant 1 : index
    %c0_43 = arith.constant 0 : index
    %c0_44 = arith.constant 0 : index
    %52 = vector.load %arg6[%c1_42, %c0_43, %c0_44] : memref<6x1x32xf32, #tpu.memory_space<vmem>>, vector<1x1x32xf32>
    %53 = vector.shape_cast %52 : vector<1x1x32xf32> to vector<1x32xf32>
    %54 = vector.broadcast %53 : vector<1x32xf32> to vector<32x32xf32>
    %55 = arith.addf %51, %54 : vector<32x32xf32>
    %56 = arith.negf %55 : vector<32x32xf32>
    %57 = math.exp %56 : vector<32x32xf32>
    %cst_45 = arith.constant 1.000000e+00 : f32
    %58 = vector.broadcast %cst_45 : f32 to vector<32x32xf32>
    %59 = arith.addf %58, %57 : vector<32x32xf32>
    %60 = arith.divf %58, %59 : vector<32x32xf32>
    %61 = arith.mulf %60, %7 : vector<32x32xf32>
    %62 = arith.truncf %61 : vector<32x32xf32> to vector<32x32xbf16>
    %c4 = arith.constant 4 : index
    %c0_46 = arith.constant 0 : index
    %c0_47 = arith.constant 0 : index
    %63 = vector.load %arg4[%c4, %c0_46, %c0_47] : memref<12x32x32xbf16, #tpu.memory_space<vmem>>, vector<1x32x32xbf16>
    %64 = vector.shape_cast %63 : vector<1x32x32xbf16> to vector<32x32xbf16>
    %cst_48 = arith.constant dense<0.000000e+00> : vector<32x32xf32>
    %65 = tpu.matmul %5, %64, %cst_48 {dimension_numbers = #tpu.dot_dimension_numbers<[1], [0], [0], [1], [0, 0, 1, 1], [], []>} : vector<32x32xbf16>, vector<32x32xbf16>, vector<32x32xf32> -> vector<32x32xf32>
    %c4_49 = arith.constant 4 : index
    %c0_50 = arith.constant 0 : index
    %c0_51 = arith.constant 0 : index
    %66 = vector.load %arg5[%c4_49, %c0_50, %c0_51] : memref<12x32x32xbf16, #tpu.memory_space<vmem>>, vector<1x32x32xbf16>
    %67 = vector.shape_cast %66 : vector<1x32x32xbf16> to vector<32x32xbf16>
    %cst_52 = arith.constant dense<0.000000e+00> : vector<32x32xf32>
    %68 = tpu.matmul %62, %67, %cst_52 {dimension_numbers = #tpu.dot_dimension_numbers<[1], [0], [0], [1], [0, 0, 1, 1], [], []>} : vector<32x32xbf16>, vector<32x32xbf16>, vector<32x32xf32> -> vector<32x32xf32>
    %69 = arith.addf %65, %68 : vector<32x32xf32>
    %c5 = arith.constant 5 : index
    %c0_53 = arith.constant 0 : index
    %c0_54 = arith.constant 0 : index
    %70 = vector.load %arg4[%c5, %c0_53, %c0_54] : memref<12x32x32xbf16, #tpu.memory_space<vmem>>, vector<1x32x32xbf16>
    %71 = vector.shape_cast %70 : vector<1x32x32xbf16> to vector<32x32xbf16>
    %cst_55 = arith.constant dense<0.000000e+00> : vector<32x32xf32>
    %72 = tpu.matmul %5, %71, %cst_55 {dimension_numbers = #tpu.dot_dimension_numbers<[1], [0], [0], [1], [0, 0, 1, 1], [], []>} : vector<32x32xbf16>, vector<32x32xbf16>, vector<32x32xf32> -> vector<32x32xf32>
    %c5_56 = arith.constant 5 : index
    %c0_57 = arith.constant 0 : index
    %c0_58 = arith.constant 0 : index
    %73 = vector.load %arg5[%c5_56, %c0_57, %c0_58] : memref<12x32x32xbf16, #tpu.memory_space<vmem>>, vector<1x32x32xbf16>
    %74 = vector.shape_cast %73 : vector<1x32x32xbf16> to vector<32x32xbf16>
    %cst_59 = arith.constant dense<0.000000e+00> : vector<32x32xf32>
    %75 = tpu.matmul %62, %74, %cst_59 {dimension_numbers = #tpu.dot_dimension_numbers<[1], [0], [0], [1], [0, 0, 1, 1], [], []>} : vector<32x32xbf16>, vector<32x32xbf16>, vector<32x32xf32> -> vector<32x32xf32>
    %76 = arith.addf %72, %75 : vector<32x32xf32>
    %77 = arith.truncf %76 : vector<32x32xf32> to vector<32x32xbf16>
    %cst_60 = arith.constant dense<0.000000e+00> : vector<32x32xf32>
    %78 = tpu.matmul %3, %77, %cst_60 {dimension_numbers = #tpu.dot_dimension_numbers<[1], [0], [0], [1], [0, 0, 1, 1], [], []>} : vector<32x32xbf16>, vector<32x32xbf16>, vector<32x32xf32> -> vector<32x32xf32>
    %79 = arith.addf %69, %78 : vector<32x32xf32>
    %c2_61 = arith.constant 2 : index
    %c0_62 = arith.constant 0 : index
    %c0_63 = arith.constant 0 : index
    %80 = vector.load %arg6[%c2_61, %c0_62, %c0_63] : memref<6x1x32xf32, #tpu.memory_space<vmem>>, vector<1x1x32xf32>
    %81 = vector.shape_cast %80 : vector<1x1x32xf32> to vector<1x32xf32>
    %82 = vector.broadcast %81 : vector<1x32xf32> to vector<32x32xf32>
    %83 = arith.addf %79, %82 : vector<32x32xf32>
    %84 = math.tanh %83 : vector<32x32xf32>
    %85 = arith.mulf %34, %7 : vector<32x32xf32>
    %cst_64 = arith.constant 1.000000e+00 : f32
    %86 = vector.broadcast %cst_64 : f32 to vector<32x32xf32>
    %87 = arith.subf %86, %34 : vector<32x32xf32>
    %88 = arith.mulf %87, %84 : vector<32x32xf32>
    %89 = arith.addf %85, %88 : vector<32x32xf32>
    %c0_65 = arith.constant 0 : index
    %c0_66 = arith.constant 0 : index
    %c0_67 = arith.constant 0 : index
    %90 = vector.load %arg11[%c0_65, %c0_66, %c0_67] : memref<2x32x32xf32, #tpu.memory_space<vmem>>, vector<1x32x32xf32>
    %91 = vector.shape_cast %90 : vector<1x32x32xf32> to vector<32x32xf32>
    %92 = vector.shape_cast %89 : vector<32x32xf32> to vector<1x32x32xf32>
    tpu.vector_store %arg11[%c0_65, %c0_66, %c0_67], %92 {strides = array<i32>} : memref<2x32x32xf32, #tpu.memory_space<vmem>>, vector<1x32x32xf32>,
    %93 = arith.truncf %89 : vector<32x32xf32> to vector<32x32xbf16>
    %c1_68 = arith.constant 1 : index
    %c0_69 = arith.constant 0 : index
    %c0_70 = arith.constant 0 : index
    %94 = vector.load %arg11[%c1_68, %c0_69, %c0_70] : memref<2x32x32xf32, #tpu.memory_space<vmem>>, vector<1x32x32xf32>
    %95 = vector.shape_cast %94 : vector<1x32x32xf32> to vector<32x32xf32>
    %96 = arith.truncf %95 : vector<32x32xf32> to vector<32x32xbf16>
    %c6 = arith.constant 6 : index
    %c0_71 = arith.constant 0 : index
    %c0_72 = arith.constant 0 : index
    %97 = vector.load %arg4[%c6, %c0_71, %c0_72] : memref<12x32x32xbf16, #tpu.memory_space<vmem>>, vector<1x32x32xbf16>
    %98 = vector.shape_cast %97 : vector<1x32x32xbf16> to vector<32x32xbf16>
    %cst_73 = arith.constant dense<0.000000e+00> : vector<32x32xf32>
    %99 = tpu.matmul %93, %98, %cst_73 {dimension_numbers = #tpu.dot_dimension_numbers<[1], [0], [0], [1], [0, 0, 1, 1], [], []>} : vector<32x32xbf16>, vector<32x32xbf16>, vector<32x32xf32> -> vector<32x32xf32>
    %c6_74 = arith.constant 6 : index
    %c0_75 = arith.constant 0 : index
    %c0_76 = arith.constant 0 : index
    %100 = vector.load %arg5[%c6_74, %c0_75, %c0_76] : memref<12x32x32xbf16, #tpu.memory_space<vmem>>, vector<1x32x32xbf16>
    %101 = vector.shape_cast %100 : vector<1x32x32xbf16> to vector<32x32xbf16>
    %cst_77 = arith.constant dense<0.000000e+00> : vector<32x32xf32>
    %102 = tpu.matmul %96, %101, %cst_77 {dimension_numbers = #tpu.dot_dimension_numbers<[1], [0], [0], [1], [0, 0, 1, 1], [], []>} : vector<32x32xbf16>, vector<32x32xbf16>, vector<32x32xf32> -> vector<32x32xf32>
    %103 = arith.addf %99, %102 : vector<32x32xf32>
    %c7 = arith.constant 7 : index
    %c0_78 = arith.constant 0 : index
    %c0_79 = arith.constant 0 : index
    %104 = vector.load %arg4[%c7, %c0_78, %c0_79] : memref<12x32x32xbf16, #tpu.memory_space<vmem>>, vector<1x32x32xbf16>
    %105 = vector.shape_cast %104 : vector<1x32x32xbf16> to vector<32x32xbf16>
    %cst_80 = arith.constant dense<0.000000e+00> : vector<32x32xf32>
    %106 = tpu.matmul %93, %105, %cst_80 {dimension_numbers = #tpu.dot_dimension_numbers<[1], [0], [0], [1], [0, 0, 1, 1], [], []>} : vector<32x32xbf16>, vector<32x32xbf16>, vector<32x32xf32> -> vector<32x32xf32>
    %c7_81 = arith.constant 7 : index
    %c0_82 = arith.constant 0 : index
    %c0_83 = arith.constant 0 : index
    %107 = vector.load %arg5[%c7_81, %c0_82, %c0_83] : memref<12x32x32xbf16, #tpu.memory_space<vmem>>, vector<1x32x32xbf16>
    %108 = vector.shape_cast %107 : vector<1x32x32xbf16> to vector<32x32xbf16>
    %cst_84 = arith.constant dense<0.000000e+00> : vector<32x32xf32>
    %109 = tpu.matmul %96, %108, %cst_84 {dimension_numbers = #tpu.dot_dimension_numbers<[1], [0], [0], [1], [0, 0, 1, 1], [], []>} : vector<32x32xbf16>, vector<32x32xbf16>, vector<32x32xf32> -> vector<32x32xf32>
    %110 = arith.addf %106, %109 : vector<32x32xf32>
    %111 = arith.truncf %110 : vector<32x32xf32> to vector<32x32xbf16>
    %cst_85 = arith.constant dense<0.000000e+00> : vector<32x32xf32>
    %112 = tpu.matmul %3, %111, %cst_85 {dimension_numbers = #tpu.dot_dimension_numbers<[1], [0], [0], [1], [0, 0, 1, 1], [], []>} : vector<32x32xbf16>, vector<32x32xbf16>, vector<32x32xf32> -> vector<32x32xf32>
    %113 = arith.addf %103, %112 : vector<32x32xf32>
    %c3_86 = arith.constant 3 : index
    %c0_87 = arith.constant 0 : index
    %c0_88 = arith.constant 0 : index
    %114 = vector.load %arg6[%c3_86, %c0_87, %c0_88] : memref<6x1x32xf32, #tpu.memory_space<vmem>>, vector<1x1x32xf32>
    %115 = vector.shape_cast %114 : vector<1x1x32xf32> to vector<1x32xf32>
    %116 = vector.broadcast %115 : vector<1x32xf32> to vector<32x32xf32>
    %117 = arith.addf %113, %116 : vector<32x32xf32>
    %118 = arith.negf %117 : vector<32x32xf32>
    %119 = math.exp %118 : vector<32x32xf32>
    %cst_89 = arith.constant 1.000000e+00 : f32
    %120 = vector.broadcast %cst_89 : f32 to vector<32x32xf32>
    %121 = arith.addf %120, %119 : vector<32x32xf32>
    %122 = arith.divf %120, %121 : vector<32x32xf32>
    %c8 = arith.constant 8 : index
    %c0_90 = arith.constant 0 : index
    %c0_91 = arith.constant 0 : index
    %123 = vector.load %arg4[%c8, %c0_90, %c0_91] : memref<12x32x32xbf16, #tpu.memory_space<vmem>>, vector<1x32x32xbf16>
    %124 = vector.shape_cast %123 : vector<1x32x32xbf16> to vector<32x32xbf16>
    %cst_92 = arith.constant dense<0.000000e+00> : vector<32x32xf32>
    %125 = tpu.matmul %93, %124, %cst_92 {dimension_numbers = #tpu.dot_dimension_numbers<[1], [0], [0], [1], [0, 0, 1, 1], [], []>} : vector<32x32xbf16>, vector<32x32xbf16>, vector<32x32xf32> -> vector<32x32xf32>
    %c8_93 = arith.constant 8 : index
    %c0_94 = arith.constant 0 : index
    %c0_95 = arith.constant 0 : index
    %126 = vector.load %arg5[%c8_93, %c0_94, %c0_95] : memref<12x32x32xbf16, #tpu.memory_space<vmem>>, vector<1x32x32xbf16>
    %127 = vector.shape_cast %126 : vector<1x32x32xbf16> to vector<32x32xbf16>
    %cst_96 = arith.constant dense<0.000000e+00> : vector<32x32xf32>
    %128 = tpu.matmul %96, %127, %cst_96 {dimension_numbers = #tpu.dot_dimension_numbers<[1], [0], [0], [1], [0, 0, 1, 1], [], []>} : vector<32x32xbf16>, vector<32x32xbf16>, vector<32x32xf32> -> vector<32x32xf32>
    %129 = arith.addf %125, %128 : vector<32x32xf32>
    %c9 = arith.constant 9 : index
    %c0_97 = arith.constant 0 : index
    %c0_98 = arith.constant 0 : index
    %130 = vector.load %arg4[%c9, %c0_97, %c0_98] : memref<12x32x32xbf16, #tpu.memory_space<vmem>>, vector<1x32x32xbf16>
    %131 = vector.shape_cast %130 : vector<1x32x32xbf16> to vector<32x32xbf16>
    %cst_99 = arith.constant dense<0.000000e+00> : vector<32x32xf32>
    %132 = tpu.matmul %93, %131, %cst_99 {dimension_numbers = #tpu.dot_dimension_numbers<[1], [0], [0], [1], [0, 0, 1, 1], [], []>} : vector<32x32xbf16>, vector<32x32xbf16>, vector<32x32xf32> -> vector<32x32xf32>
    %c9_100 = arith.constant 9 : index
    %c0_101 = arith.constant 0 : index
    %c0_102 = arith.constant 0 : index
    %133 = vector.load %arg5[%c9_100, %c0_101, %c0_102] : memref<12x32x32xbf16, #tpu.memory_space<vmem>>, vector<1x32x32xbf16>
    %134 = vector.shape_cast %133 : vector<1x32x32xbf16> to vector<32x32xbf16>
    %cst_103 = arith.constant dense<0.000000e+00> : vector<32x32xf32>
    %135 = tpu.matmul %96, %134, %cst_103 {dimension_numbers = #tpu.dot_dimension_numbers<[1], [0], [0], [1], [0, 0, 1, 1], [], []>} : vector<32x32xbf16>, vector<32x32xbf16>, vector<32x32xf32> -> vector<32x32xf32>
    %136 = arith.addf %132, %135 : vector<32x32xf32>
    %137 = arith.truncf %136 : vector<32x32xf32> to vector<32x32xbf16>
    %cst_104 = arith.constant dense<0.000000e+00> : vector<32x32xf32>
    %138 = tpu.matmul %3, %137, %cst_104 {dimension_numbers = #tpu.dot_dimension_numbers<[1], [0], [0], [1], [0, 0, 1, 1], [], []>} : vector<32x32xbf16>, vector<32x32xbf16>, vector<32x32xf32> -> vector<32x32xf32>
    %139 = arith.addf %129, %138 : vector<32x32xf32>
    %c4_105 = arith.constant 4 : index
    %c0_106 = arith.constant 0 : index
    %c0_107 = arith.constant 0 : index
    %140 = vector.load %arg6[%c4_105, %c0_106, %c0_107] : memref<6x1x32xf32, #tpu.memory_space<vmem>>, vector<1x1x32xf32>
    %141 = vector.shape_cast %140 : vector<1x1x32xf32> to vector<1x32xf32>
    %142 = vector.broadcast %141 : vector<1x32xf32> to vector<32x32xf32>
    %143 = arith.addf %139, %142 : vector<32x32xf32>
    %144 = arith.negf %143 : vector<32x32xf32>
    %145 = math.exp %144 : vector<32x32xf32>
    %cst_108 = arith.constant 1.000000e+00 : f32
    %146 = vector.broadcast %cst_108 : f32 to vector<32x32xf32>
    %147 = arith.addf %146, %145 : vector<32x32xf32>
    %148 = arith.divf %146, %147 : vector<32x32xf32>
    %149 = arith.mulf %148, %95 : vector<32x32xf32>
    %150 = arith.truncf %149 : vector<32x32xf32> to vector<32x32xbf16>
    %c10 = arith.constant 10 : index
    %c0_109 = arith.constant 0 : index
    %c0_110 = arith.constant 0 : index
    %151 = vector.load %arg4[%c10, %c0_109, %c0_110] : memref<12x32x32xbf16, #tpu.memory_space<vmem>>, vector<1x32x32xbf16>
    %152 = vector.shape_cast %151 : vector<1x32x32xbf16> to vector<32x32xbf16>
    %cst_111 = arith.constant dense<0.000000e+00> : vector<32x32xf32>
    %153 = tpu.matmul %93, %152, %cst_111 {dimension_numbers = #tpu.dot_dimension_numbers<[1], [0], [0], [1], [0, 0, 1, 1], [], []>} : vector<32x32xbf16>, vector<32x32xbf16>, vector<32x32xf32> -> vector<32x32xf32>
    %c10_112 = arith.constant 10 : index
    %c0_113 = arith.constant 0 : index
    %c0_114 = arith.constant 0 : index
    %154 = vector.load %arg5[%c10_112, %c0_113, %c0_114] : memref<12x32x32xbf16, #tpu.memory_space<vmem>>, vector<1x32x32xbf16>
    %155 = vector.shape_cast %154 : vector<1x32x32xbf16> to vector<32x32xbf16>
    %cst_115 = arith.constant dense<0.000000e+00> : vector<32x32xf32>
    %156 = tpu.matmul %150, %155, %cst_115 {dimension_numbers = #tpu.dot_dimension_numbers<[1], [0], [0], [1], [0, 0, 1, 1], [], []>} : vector<32x32xbf16>, vector<32x32xbf16>, vector<32x32xf32> -> vector<32x32xf32>
    %157 = arith.addf %153, %156 : vector<32x32xf32>
    %c11 = arith.constant 11 : index
    %c0_116 = arith.constant 0 : index
    %c0_117 = arith.constant 0 : index
    %158 = vector.load %arg4[%c11, %c0_116, %c0_117] : memref<12x32x32xbf16, #tpu.memory_space<vmem>>, vector<1x32x32xbf16>
    %159 = vector.shape_cast %158 : vector<1x32x32xbf16> to vector<32x32xbf16>
    %cst_118 = arith.constant dense<0.000000e+00> : vector<32x32xf32>
    %160 = tpu.matmul %93, %159, %cst_118 {dimension_numbers = #tpu.dot_dimension_numbers<[1], [0], [0], [1], [0, 0, 1, 1], [], []>} : vector<32x32xbf16>, vector<32x32xbf16>, vector<32x32xf32> -> vector<32x32xf32>
    %c11_119 = arith.constant 11 : index
    %c0_120 = arith.constant 0 : index
    %c0_121 = arith.constant 0 : index
    %161 = vector.load %arg5[%c11_119, %c0_120, %c0_121] : memref<12x32x32xbf16, #tpu.memory_space<vmem>>, vector<1x32x32xbf16>
    %162 = vector.shape_cast %161 : vector<1x32x32xbf16> to vector<32x32xbf16>
    %cst_122 = arith.constant dense<0.000000e+00> : vector<32x32xf32>
    %163 = tpu.matmul %150, %162, %cst_122 {dimension_numbers = #tpu.dot_dimension_numbers<[1], [0], [0], [1], [0, 0, 1, 1], [], []>} : vector<32x32xbf16>, vector<32x32xbf16>, vector<32x32xf32> -> vector<32x32xf32>
    %164 = arith.addf %160, %163 : vector<32x32xf32>
    %165 = arith.truncf %164 : vector<32x32xf32> to vector<32x32xbf16>
    %cst_123 = arith.constant dense<0.000000e+00> : vector<32x32xf32>
    %166 = tpu.matmul %3, %165, %cst_123 {dimension_numbers = #tpu.dot_dimension_numbers<[1], [0], [0], [1], [0, 0, 1, 1], [], []>} : vector<32x32xbf16>, vector<32x32xbf16>, vector<32x32xf32> -> vector<32x32xf32>
    %167 = arith.addf %157, %166 : vector<32x32xf32>
    %c5_124 = arith.constant 5 : index
    %c0_125 = arith.constant 0 : index
    %c0_126 = arith.constant 0 : index
    %168 = vector.load %arg6[%c5_124, %c0_125, %c0_126] : memref<6x1x32xf32, #tpu.memory_space<vmem>>, vector<1x1x32xf32>
    %169 = vector.shape_cast %168 : vector<1x1x32xf32> to vector<1x32xf32>
    %170 = vector.broadcast %169 : vector<1x32xf32> to vector<32x32xf32>
    %171 = arith.addf %167, %170 : vector<32x32xf32>
    %172 = math.tanh %171 : vector<32x32xf32>
    %173 = arith.mulf %122, %95 : vector<32x32xf32>
    %cst_127 = arith.constant 1.000000e+00 : f32
    %174 = vector.broadcast %cst_127 : f32 to vector<32x32xf32>
    %175 = arith.subf %174, %122 : vector<32x32xf32>
    %176 = arith.mulf %175, %172 : vector<32x32xf32>
    %177 = arith.addf %173, %176 : vector<32x32xf32>
    %c1_128 = arith.constant 1 : index
    %c0_129 = arith.constant 0 : index
    %c0_130 = arith.constant 0 : index
    %178 = vector.load %arg11[%c1_128, %c0_129, %c0_130] : memref<2x32x32xf32, #tpu.memory_space<vmem>>, vector<1x32x32xf32>
    %179 = vector.shape_cast %178 : vector<1x32x32xf32> to vector<32x32xf32>
    %180 = vector.shape_cast %177 : vector<32x32xf32> to vector<1x32x32xf32>
    tpu.vector_store %arg11[%c1_128, %c0_129, %c0_130], %180 {strides = array<i32>} : memref<2x32x32xf32, #tpu.memory_space<vmem>>, vector<1x32x32xf32>,
    %c1_131 = arith.constant 1 : index
    %c0_132 = arith.constant 0 : index
    %c0_133 = arith.constant 0 : index
    %181 = vector.load %arg11[%c1_131, %c0_132, %c0_133] : memref<2x32x32xf32, #tpu.memory_space<vmem>>, vector<1x32x32xf32>
    %182 = vector.shape_cast %181 : vector<1x32x32xf32> to vector<32x32xf32>
    %183 = arith.truncf %182 : vector<32x32xf32> to vector<32x32xbf16>
    %c0_134 = arith.constant 0 : index
    %c0_135 = arith.constant 0 : index
    %184 = vector.load %arg7[%c0_134, %c0_135] : memref<32x128xbf16, #tpu.memory_space<vmem>>, vector<32x128xbf16>
    %cst_136 = arith.constant dense<0.000000e+00> : vector<32x128xf32>
    %185 = tpu.matmul %183, %184, %cst_136 {dimension_numbers = #tpu.dot_dimension_numbers<[1], [0], [0], [1], [0, 0, 1, 1], [], []>} : vector<32x32xbf16>, vector<32x128xbf16>, vector<32x128xf32> -> vector<32x128xf32>
    %c0_137 = arith.constant 0 : index
    %c0_138 = arith.constant 0 : index
    %186 = vector.load %arg8[%c0_137, %c0_138] : memref<1x128xf32, #tpu.memory_space<vmem>>, vector<1x128xf32>
    %187 = vector.broadcast %186 : vector<1x128xf32> to vector<32x128xf32>
    %188 = arith.addf %185, %187 : vector<32x128xf32>
    %c0_139 = arith.constant 0 : index
    %c0_140 = arith.constant 0 : index
    %c0_141 = arith.constant 0 : index
    %189 = vector.load %arg9[%c0_139, %c0_140, %c0_141] : memref<1x32x128xf32, #tpu.memory_space<vmem>>, vector<1x32x128xf32>
    %190 = vector.shape_cast %189 : vector<1x32x128xf32> to vector<32x128xf32>
    %191 = vector.shape_cast %188 : vector<32x128xf32> to vector<1x32x128xf32>
    tpu.vector_store %arg9[%c0_139, %c0_140, %c0_141], %191 {strides = array<i32>} : memref<1x32x128xf32, #tpu.memory_space<vmem>>, vector<1x32x128xf32>,
    %c7_i32 = arith.constant 7 : i32
    %192 = arith.cmpi eq, %arg0, %c7_i32 : i32
    %193 = arith.extui %192 : i1 to i32
    %c0_i32_142 = arith.constant 0 : i32
    %194 = arith.cmpi ne, %193, %c0_i32_142 : i32
    scf.if %194 {
      %c0_143 = arith.constant 0 : index
      %c0_144 = arith.constant 0 : index
      %c0_145 = arith.constant 0 : index
      %195 = vector.load %arg11[%c0_143, %c0_144, %c0_145] : memref<2x32x32xf32, #tpu.memory_space<vmem>>, vector<2x32x32xf32>
      %c0_146 = arith.constant 0 : index
      %c0_147 = arith.constant 0 : index
      %c0_148 = arith.constant 0 : index
      %196 = vector.load %arg10[%c0_146, %c0_147, %c0_148] : memref<2x32x32xf32, #tpu.memory_space<vmem>>, vector<2x32x32xf32>
      tpu.vector_store %arg10[%c0_146, %c0_147, %c0_148], %195 {strides = array<i32>} : memref<2x32x32xf32, #tpu.memory_space<vmem>>, vector<2x32x32xf32>,
    } else {
    }
    return
  }
  func.func @transform_0(%arg0: i32) -> (i32, i32, i32) {
    %c0_i32 = arith.constant 0 : i32
    %c0_i32_0 = arith.constant 0 : i32
    %c0_i32_1 = arith.constant 0 : i32
    return %arg0, %c0_i32, %c0_i32_0 : i32, i32, i32
  }
  func.func @transform_1(%arg0: i32) -> (i32, i32, i32) {
    %c0_i32 = arith.constant 0 : i32
    %c0_i32_0 = arith.constant 0 : i32
    %c0_i32_1 = arith.constant 0 : i32
    %c0_i32_2 = arith.constant 0 : i32
    return %c0_i32, %c0_i32_0, %c0_i32_1 : i32, i32, i32
  }
  func.func @transform_2(%arg0: i32) -> (i32, i32) {
    %c0_i32 = arith.constant 0 : i32
    %c0_i32_0 = arith.constant 0 : i32
    %c0_i32_1 = arith.constant 0 : i32
    return %c0_i32, %c0_i32_0 : i32, i32
  }
  func.func @transform_3(%arg0: i32) -> (i32, i32, i32) {
    %c0_i32 = arith.constant 0 : i32
    %c0_i32_0 = arith.constant 0 : i32
    %c0_i32_1 = arith.constant 0 : i32
    %c0_i32_2 = arith.constant 0 : i32
    return %c0_i32, %c0_i32_0, %c0_i32_1 : i32, i32, i32
  }
  func.func @transform_4(%arg0: i32) -> (i32, i32, i32) {
    %c0_i32 = arith.constant 0 : i32
    %c0_i32_0 = arith.constant 0 : i32
    %c0_i32_1 = arith.constant 0 : i32
    %c0_i32_2 = arith.constant 0 : i32
    return %c0_i32, %c0_i32_0, %c0_i32_1 : i32, i32, i32
  }
  func.func @transform_5(%arg0: i32) -> (i32, i32, i32) {
    %c0_i32 = arith.constant 0 : i32
    %c0_i32_0 = arith.constant 0 : i32
    %c0_i32_1 = arith.constant 0 : i32
    %c0_i32_2 = arith.constant 0 : i32
    return %c0_i32, %c0_i32_0, %c0_i32_1 : i32, i32, i32
  }
  func.func @transform_6(%arg0: i32) -> (i32, i32) {
    %c0_i32 = arith.constant 0 : i32
    %c0_i32_0 = arith.constant 0 : i32
    %c0_i32_1 = arith.constant 0 : i32
    return %c0_i32, %c0_i32_0 : i32, i32
  }
  func.func @transform_7(%arg0: i32) -> (i32, i32) {
    %c0_i32 = arith.constant 0 : i32
    %c0_i32_0 = arith.constant 0 : i32
    %c0_i32_1 = arith.constant 0 : i32
    return %c0_i32, %c0_i32_0 : i32, i32
  }
  func.func @transform_8(%arg0: i32) -> (i32, i32, i32) {
    %c0_i32 = arith.constant 0 : i32
    %c0_i32_0 = arith.constant 0 : i32
    %c0_i32_1 = arith.constant 0 : i32
    return %arg0, %c0_i32, %c0_i32_0 : i32, i32, i32
  }
  func.func @transform_9(%arg0: i32) -> (i32, i32, i32) {
    %c0_i32 = arith.constant 0 : i32
    %c0_i32_0 = arith.constant 0 : i32
    %c0_i32_1 = arith.constant 0 : i32
    %c0_i32_2 = arith.constant 0 : i32
    return %c0_i32, %c0_i32_0, %c0_i32_1 : i32, i32, i32
  }
}

</mosaic_0001>

<bundles_post_ra>
// kernel: tpu_custom_call.1
= control target key start
LH: loop header
LB: loop body
LE: loop exit
PB: predicated region body
PF: predicated region fallthrough
CT: control target
= control target key end

     0   :  { %s4620_s0 = inlined_call_operand.hbm [shape: bf16[8,32,32], index: 0, kind: input, shape index: {}]   ;;  %s4621_s1 = inlined_call_operand.hbm [shape: f32[2,32,32], index: 1, kind: input, shape index: {}]   ;;  %s4622_s2 = inlined_call_operand.hbm [shape: bf16[32,32], index: 2, kind: input, shape index: {}]   ;;  %s4623_s3 = inlined_call_operand.hbm [shape: bf16[12,32,32], index: 3, kind: input, shape index: {}]   ;;  %s4624_s4 = inlined_call_operand.hbm [shape: bf16[12,32,32], index: 4, kind: input, shape index: {}]   ;;  %s4625_s5 = inlined_call_operand.vmem [shape: f32[6,1,32], index: 5, kind: input, shape index: {}]   ;;  %s4626_s6 = inlined_call_operand.vmem [shape: bf16[32,128], index: 6, kind: input, shape index: {}]   ;;  %s4627_s7 = inlined_call_operand.vmem [shape: f32[1,128], index: 7, kind: input, shape index: {}]   ;;  %s4628_s8 = inlined_call_operand.hbm [shape: f32[8,32,128], index: 8, kind: output, shape index: {0}]   ;;  %s4629_s9 = inlined_call_operand.hbm [shape: f32[2,32,32], index: 9, kind: output, shape index: {1}]  }
   0x1   :  { %4637 = sst [smem:[#allocation22_spill]] %s4628_s8 }
   0x2   :  { %4638 = sst [smem:[#allocation23_spill]] %s4629_s9 }
   0x3   :  { %15 = vsyncpa [#allocation4], 0 }
   0x4   :  { %17 = vsyncpa [#allocation4 + $0x1], 0 }
   0x5   :  { %18 = vsyncpa [#allocation7], 0 }
   0x6   :  { %19 = vsyncpa [#allocation10], 0 }
   0x7   :  { %20 = vsyncpa [#allocation5], 0 }
   0x8   :  { %22 = vsyncpa [#allocation5 + $0x1], 0 }
   0x9   :  { %23 = vsyncpa [#allocation14], 0  ;;  %s4073_s30 = smov 0   ;;  %s4075_s10 = smov 0  }
   0xa   :  { %s4077_s11 = smov 0   ;;  %s4079_s12 = smov 0  }
   0xb LB: > { %4639 = sst [smem:[#allocation20_spill]] %s3996_s30  ;;  %s4094_s13 = sadd.s32 4294967295, %s4008_s12   ;;  %s4008_s12 = sphi %s4079_s12, %s4669_s12   ;;  %s4004_s11 = sphi %s4077_s11, %s4668_s11   ;;  %s4000_s10 = sphi %s4075_s10, %s4667_s10   ;;  %s3996_s30 = sphi %s4073_s30, %s4666_s30  }
   0xc   : > { %s2912_s14 = sadd.s32 4294967294, %s4008_s12   ;;  %p49_p0 = scmp.ne.s32.totalorder %s4000_s10, %s3996_s30 }
   0xd   : > { %p4630_p1 = scmp.eq.s32.totalorder %s4094_s13, 0  ;;  %p226_p3 = scmp.eq.s32.totalorder %s2912_s14, 7 }
   0xe   : > { %p2913_p5 = scmp.ge.s32.totalorder %s4008_s12, 1  ;;  %p254_p7 = scmp.lt.s32.totalorder %s4008_s12, 9 }
   0xf   : > { %p4103_p4 = por %p4630_p1, %p49_p0  ;;  %p4108_p6 = por %p226_p3, %p49_p0 }
  0x10   : > { %p4114_p9 = pnand %p2913_p5, %p254_p7  ;;  %s4010_s18 = smov [#allocation6]  }
  0x11   : > { %s4640_s15 = scalar_select %p4103_p4, 1, 0 }
  0x12   : > { %s4641_s16 = scalar_select %p4108_p6, 1, 0 }
  0x13   : > { %s4643_s17 = scalar_select %p4114_p9, 1, 0 }
  0x14   : > { %4642 = sst [smem:[#allocation21_spill]] %s4641_s16  ;;  %s266_s19 = sshll.u32 %s4010_s18, 4  ;;  %s267_s19 = int_to_ptr.vmem [resolvable:$true] %s266_s19 }
  0x15   : > { %p3552_p10 = pneg %p4114_p9  ;;  %s4011_s21 = smov [#allocation9]  }
  0x16   : > { %s292_s22 = sshll.u32 %s4011_s21, 4  ;;  %s3762_s25 = scalar_lea.hbm %s4621_s1, 1024  ;;  %s293_s22 = int_to_ptr.vmem [resolvable:$true] %s292_s22 }
  0x17   : > { %p4122_p11 = pnand %p3552_p10, %p4630_p1  ;;  %p3763_p12 = scmp.ne.s32.totalorder %s4621_s1, %s3762_s25 }
  0x18   : > { %p3769_p5 = scmp.lt.u32.totalorder %s3762_s25, %s4621_s1 }
  0x19   : > { %p4134_p13 = pneg %p4122_p11 }
  0x1b   : > { %p3765_p0 = pnand %p4134_p13, %p3763_p12 }
  0x1d   : > { %p3766_p3 = pneg %p3765_p0 }
  0x1f   : > { %p3771_p7 = pnand %p3769_p5, %p3766_p3 }
  0x21   : > { %3774 = shalt.err (!%p3771_p7)
}
  0x22   : > { %s3775_s18 = scalar_lea.vmem %s267_s19, 1024  ;;  %p3783_p2 = scmp.lt.s32.totalorder %s267_s19, %s267_s19 }
  0x23   : > { %p3776_p10 = scmp.ne.s32.totalorder %s267_s19, %s3775_s18  ;;  %p3784_p6 = scmp.lt.s32.totalorder %s3775_s18, %s3775_s18 }
  0x25   : > { %p3778_p8 = pnand %p3776_p10, %p4134_p13  ;;  %p3785_p4 = por %p3784_p6, %p3783_p2 }
  0x27   : > { %p3779_p1 = pneg %p3778_p8 }
  0x29   : > { %p3786_p9 = pnand %p3785_p4, %p3779_p1 }
  0x2b   : > { %3789 = shalt.err (!%p3786_p9)
}
  0x2c   : > { %s4012_s21 = smov 128   ;;  %s4013_s23 = smov 8  }
  0x2d   : > { %3555 = dma.hbm_to_vmem [thread:$0]  (!%p4122_p11), %s4621_s1, 1024, %s267_s19, [#allocation7], %s4012_s21, %s4012_s21, %s4013_s23  }
  0x2e   : > { %s4014_s26 = smov [#allocation8]   ;;  %s3790_s16 = scalar_lea.hbm %s4623_s3, 3072 }
  0x2f   : > { %s279_s27 = sshll.u32 %s4014_s26, 4  ;;  %p3791_p1 = scmp.ne.s32.totalorder %s4623_s3, %s3790_s16  ;;  %s280_s27 = int_to_ptr.vmem [resolvable:$true] %s279_s27 }
  0x30   : > { %p3797_p6 = scmp.lt.u32.totalorder %s3790_s16, %s4623_s3 }
  0x31   : > { %p3793_p2 = pnand %p3791_p1, %p4134_p13 }
  0x33   : > { %p3794_p4 = pneg %p3793_p2 }
  0x35   : > { %p3799_p8 = pnand %p3797_p6, %p3794_p4 }
  0x37   : > { %3802 = shalt.err (!%p3799_p8)
}
  0x38   : > { %s3803_s19 = scalar_lea.vmem %s293_s22, 3072  ;;  %p3811_p3 = scmp.lt.s32.totalorder %s293_s22, %s293_s22 }
  0x39   : > { %p3804_p9 = scmp.ne.s32.totalorder %s293_s22, %s3803_s19  ;;  %p3812_p5 = scmp.lt.s32.totalorder %s3803_s19, %s3803_s19 }
  0x3b   : > { %p3806_p12 = pnand %p3804_p9, %p4134_p13  ;;  %p3813_p7 = por %p3812_p5, %p3811_p3 }
  0x3d   : > { %p3807_p0 = pneg %p3806_p12 }
  0x3f   : > { %p3814_p10 = pnand %p3813_p7, %p3807_p0 }
  0x41   : > { %3817 = shalt.err (!%p3814_p10)
}
  0x42   : > { %s4015_s30 = smov 64   ;;  %s4016_s21 = smov 4  }
  0x43   : > { %3561 = dma.hbm_to_vmem [thread:$0]  (!%p4122_p11), %s4623_s3, 3072, %s293_s22, [#allocation10], %s4015_s30, %s4015_s30, %s4016_s21  }
  0x44   : > { %s3818_s24 = scalar_lea.hbm %s4622_s2, 256 }
  0x45   : > { %p3819_p1 = scmp.ne.s32.totalorder %s4622_s2, %s3818_s24  ;;  %p3825_p6 = scmp.lt.u32.totalorder %s3818_s24, %s4622_s2 }
  0x47   : > { %p3821_p2 = pnand %p3819_p1, %p4134_p13 }
  0x49   : > { %p3822_p4 = pneg %p3821_p2 }
  0x4b   : > { %p3827_p8 = pnand %p3825_p6, %p3822_p4 }
  0x4d   : > { %3830 = shalt.err (!%p3827_p8)
}
  0x4e   : > { %s3831_s18 = scalar_lea.vmem %s280_s27, 256  ;;  %p3839_p3 = scmp.lt.s32.totalorder %s280_s27, %s280_s27 }
  0x4f   : > { %p3832_p9 = scmp.ne.s32.totalorder %s280_s27, %s3831_s18  ;;  %p3840_p5 = scmp.lt.s32.totalorder %s3831_s18, %s3831_s18 }
  0x51   : > { %p3834_p12 = pnand %p3832_p9, %p4134_p13  ;;  %p3841_p7 = por %p3840_p5, %p3839_p3 }
  0x53   : > { %p3835_p0 = pneg %p3834_p12 }
  0x55   : > { %p3842_p10 = pnand %p3841_p7, %p3835_p0 }
  0x57   : > { %3845 = shalt.err (!%p3842_p10)
}
  0x58   : > { %3558 = dma.hbm_to_vmem [thread:$0]  (!%p4122_p11), %s4622_s2, 256, %s280_s27, [#allocation7], %s4015_s30, %s4015_s30, %s4016_s21  }
  0x59   : > { %s4017_s8 = smov [#allocation11]   ;;  %s3846_s24 = scalar_lea.hbm %s4624_s4, 3072 }
  0x5a   : > { %s305_s9 = sshll.u32 %s4017_s8, 4  ;;  %p3847_p1 = scmp.ne.s32.totalorder %s4624_s4, %s3846_s24  ;;  %s306_s9 = int_to_ptr.vmem [resolvable:$true] %s305_s9 }
  0x5b   : > { %p3853_p6 = scmp.lt.u32.totalorder %s3846_s24, %s4624_s4 }
  0x5c   : > { %p3849_p2 = pnand %p3847_p1, %p4134_p13 }
  0x5e   : > { %p3850_p4 = pneg %p3849_p2 }
  0x60   : > { %p3855_p8 = pnand %p3853_p6, %p3850_p4 }
  0x62   : > { %3858 = shalt.err (!%p3855_p8)
}
  0x63   : > { %s3859_s27 = scalar_lea.vmem %s306_s9, 3072  ;;  %p3867_p3 = scmp.lt.s32.totalorder %s306_s9, %s306_s9 }
  0x64   : > { %p3860_p9 = scmp.ne.s32.totalorder %s306_s9, %s3859_s27  ;;  %p3868_p5 = scmp.lt.s32.totalorder %s3859_s27, %s3859_s27 }
  0x66   : > { %p3862_p12 = pnand %p3860_p9, %p4134_p13  ;;  %p3869_p7 = por %p3868_p5, %p3867_p3 }
  0x68   : > { %p3863_p0 = pneg %p3862_p12 }
  0x6a   : > { %p3870_p10 = pnand %p3869_p7, %p3863_p0 }
  0x6c   : > { %3873 = shalt.err (!%p3870_p10)
}
  0x6d   : > { %3564 = dma.hbm_to_vmem [thread:$0]  (!%p4122_p11), %s4624_s4, 3072, %s306_s9, [#allocation10], %s4015_s30, %s4015_s30, %s4016_s21  }
  0x6e   : > { %s4214_s28 = sadd.s32 1, %s4008_s12   ;;  %s36_s20 = sadd.s32 1, %s4004_s11 }
  0x6f   : > { %s33_s19 = ssub.s32 %s4008_s12, %s4214_s28  ;;  %p43_p13 = scmp.ne.s32.totalorder %s4004_s11, %s4000_s10 }
  0x70   : > { %p34_p1 = scmp.eq.s32.totalorder %s33_s19, 0  ;;  %p44_p2 = scmp.eq.s32.totalorder %s4008_s12, 0 }
  0x71   : > { %p4646_p4 = scmp.eq.s32.totalorder %s4094_s13, 7  ;;  %p3577_p8 = scmp.lt.s32.totalorder %s4008_s12, 8 }
  0x72   : > { %s4230_s16 = scalar_select %p34_p1, %s4004_s11, %s36_s20  }
  0x73   : > { %p4224_p6 = por %p4646_p4, %p43_p13  ;;  %p45_p9 = por %p44_p2, %p43_p13 }
  0x74   : > { %s328_s23 = sand.u32 1, %s4004_s11   ;;  %s3082_s9 = sshll.u32 %s4008_s12, 8 }
  0x75   : > { %s2919_s24 = sshll.u32 %s328_s23, 4  ;;  %s4237_s29 = scalar_lea.hbm %s4620_s0, %s3082_s9 }
  0x76   : > { %s332_s14 = scalar_lea.vmem [#allocation3], %s2919_s24  ;;  %p4241_p11 = pnand %p3577_p8, %p45_p9 }
  0x77   : > { %s339_s27 = sshll.u32 %s332_s14, 4  ;;  %s4245_s22 = scalar_lea.sflag [#allocation4], %s328_s23  ;;  %s4239_s27 = int_to_ptr.vmem [resolvable:$true] %s339_s27 }
  0x78   : > { %s3874_s20 = scalar_lea.hbm %s4237_s29, 256  ;;  %p3876_p0 = pneg %p4241_p11 }
  0x79   : > { %p3875_p12 = scmp.ne.s32.totalorder %s4237_s29, %s3874_s20  ;;  %s3879_s9 = scalar_lea.hbm %s4620_s0, 2048 }
  0x7a   : > { %p3880_p7 = scmp.lt.u32.totalorder %s4237_s29, %s4620_s0  ;;  %p3881_p10 = scmp.lt.u32.totalorder %s3879_s9, %s3874_s20 }
  0x7b   : > { %p3877_p3 = pnand %p3876_p0, %p3875_p12  ;;  %p3883_p1 = scmp.lt.u32.totalorder %s3874_s20, %s4237_s29 }
  0x7c   : > { %p3882_p13 = por %p3881_p10, %p3880_p7 }
  0x7d   : > { %p3878_p5 = pneg %p3877_p3 }
  0x7e   : > { %p3884_p2 = por %p3883_p1, %p3882_p13 }
  0x80   : > { %p3885_p4 = pnand %p3884_p2, %p3878_p5 }
  0x82   : > { %3888 = shalt.err (!%p3885_p4)
}
  0x83   : > { %s3889_s23 = scalar_lea.vmem %s4239_s27, 256  ;;  %s4018_s14 = smov [#allocation3]  }
  0x84   : > { %p3890_p8 = scmp.ne.s32.totalorder %s4239_s27, %s3889_s23  ;;  %s3894_s19 = sshll.u32 %s4018_s14, 4  ;;  %s3895_s19 = int_to_ptr.vmem [resolvable:$false] %s3894_s19 }
  0x85   : > { %s3896_s24 = scalar_lea.vmem %s3895_s19, 512  ;;  %p3897_p3 = scmp.lt.s32.totalorder %s4239_s27, %s3895_s19 }
  0x86   : > { %p3892_p9 = pnand %p3890_p8, %p3876_p0  ;;  %p3898_p7 = scmp.lt.s32.totalorder %s3896_s24, %s3889_s23 }
  0x88   : > { %p3893_p12 = pneg %p3892_p9  ;;  %p3899_p10 = por %p3898_p7, %p3897_p3 }
  0x8a   : > { %p3900_p13 = pnand %p3899_p10, %p3893_p12 }
  0x8c   : > { %3903 = shalt.err (!%p3900_p13)
}
  0x8d   : > { %3568 = dma.hbm_to_vmem [thread:$0]  (!%p4241_p11), %s4237_s29, 256, %s4239_s27, %s4245_s22, %s4015_s30, %s4015_s30, %s4016_s21  }
  0x8e   : > { %p4649_p0 = scmp.ne.s32.totalorder %s4643_s17, 0 }
  0x8f   : > { %s4279_s20 = sand.u32 (!%p4649_p0), 1, %s4000_s10   ;;  %p4650_p5 = scmp.ne.s32.totalorder (!%p4649_p0), %s4640_s15, 0 }
  0x90   : > { %351 = sbr.rel (%p4649_p0) target bundleno = 2854 (0xb26), region = 52  ;;  %s2923_s9 = sshll.u32 (!%p4649_p0), %s4279_s20, 4 }
  0x91   : > { %s354_s25 = scalar_lea.sflag (!%p4649_p0), [#allocation4], %s4279_s20  ;;  %s4283_s26 = scalar_lea.vmem (!%p4649_p0), [#allocation3], %s2923_s9 }
  0x97   : > { %3975 = dma.done.wait (%p4650_p5), %s354_s25, 256  }
  0x98   : > { %3977 = vsyncadd (%p4650_p5), %s354_s25, 4294967040  ;;  %p4651_p11 = scmp.eq.s32.totalorder %s4094_s13, 0 }
  0x9a   : > { %3979 = dma.done.wait (%p4651_p11), [#allocation7], 1280   ;;  %p4652_p1 = pmov %p4651_p11 }
  0x9c   : > { %3981 = vsyncadd (%p4652_p1), [#allocation7], 4294966016  ;;  %p4653_p2 = pmov %p4652_p1 }
  0x9d   : > { %p4654_p4 = pmov %p4652_p1 }
  0x9e   : > { %3983 = dma.done.wait (%p4653_p2), [#allocation10], 6144  }
  0x9f   : > { %3985 = vsyncadd (%p4654_p4), [#allocation10], 4294961152  ;;  %s2928_s17 = sshll.u32 %s4279_s20, 5  ;;  %p4655_p8 = scmp.ne.s32.totalorder %s4094_s13, 0 }
  0xa0   : > { %s4298_s30 = scalar_lea.vmem [#allocation12], %s2928_s17  ;;  %v413_v0 = vld [vmem:[#allocation6] sm:$0xff] (!%p4655_p8)  ;;  %vm421_vm0 = vcmask (!%p4655_p8), 261120   ;;  %v414_v1 = vld [vmem:[#allocation6 + $0x8] sm:$0xff] (!%p4655_p8)  ;;  %v415_v2 = vld [vmem:[#allocation6 + $0x10] sm:$0xff] (!%p4655_p8) }
  0xa1   : > { %412 = sbr.rel (%p4655_p8) target bundleno = 168 (0xa8), region = 76  ;;  %422 = vst.msk [vmem:[#allocation2] sm:$0xff] (!%p4655_p8), %vm421_vm0, %v413_v0  ;;  %423 = vst.msk [vmem:[#allocation2 + $0x8] sm:$0xff] (!%p4655_p8), %vm421_vm0, %v414_v1  ;;  %v416_v3 = vld [vmem:[#allocation6 + $0x18] sm:$0xff] (!%p4655_p8)  ;;  %v417_v4 = vld [vmem:[#allocation6 + $0x20] sm:$0xff] (!%p4655_p8) }
  0xa2   : > { %424 = vst.msk [vmem:[#allocation2 + $0x10] sm:$0xff] (!%p4655_p8), %vm421_vm0, %v415_v2  ;;  %v418_v5 = vld [vmem:[#allocation6 + $0x28] sm:$0xff] (!%p4655_p8)  ;;  %425 = vst.msk [vmem:[#allocation2 + $0x18] sm:$0xff] (!%p4655_p8), %vm421_vm0, %v416_v3  ;;  %v419_v6 = vld [vmem:[#allocation6 + $0x30] sm:$0xff] (!%p4655_p8) }
  0xa3   : > { %426 = vst.msk [vmem:[#allocation2 + $0x20] sm:$0xff] (!%p4655_p8), %vm421_vm0, %v417_v4  ;;  %427 = vst.msk [vmem:[#allocation2 + $0x28] sm:$0xff] (!%p4655_p8), %vm421_vm0, %v418_v5  ;;  %v420_v7 = vld [vmem:[#allocation6 + $0x38] sm:$0xff] (!%p4655_p8) }
  0xa4   : > { %428 = vst.msk [vmem:[#allocation2 + $0x30] sm:$0xff] (!%p4655_p8), %vm421_vm0, %v419_v6  ;;  %429 = vst.msk [vmem:[#allocation2 + $0x38] sm:$0xff] (!%p4655_p8), %vm421_vm0, %v420_v7 }
  0xa8 PF: > { %v3628_v8 = vld [vmem:[#allocation11 + $0x10] sm:$0xff]   ;;  %v3629_v9 = vld [vmem:[#allocation11 + $0x18] sm:$0xff]   ;;  %vm464_vm1 = vcmask 261120   ;;  %v3634_v19 = vld [vmem:[#allocation11] sm:$0xff]   ;;  %p3074_p9 = scmp.ne.s32.totalorder %s4094_s13, 7 }
  0xa9   : > { %3224 = vmatprep.subr.bf16.mxu1 %v3628_v8  ;;  %v4302_v10 = vld [vmem:[#allocation2] sm:$0xff]  ;;  %v4304_v11 = vld [vmem:[#allocation2 + $0x8] sm:$0xff]  ;;  %v4306_v12 = vld [vmem:[#allocation2 + $0x10] sm:$0xff]  ;;  %3208 = vmatprep.subr.bf16.mxu0 %v3634_v19 }
  0xaa   : > { %3225 = vmatpush3.bf16.msra.mxu1 %v3628_v8  ;;  %v442_v13 = vpack.c.bf16 %v4304_v11, %v4302_v10  ;;  %v4310_v14 = vld [vmem:[#allocation2 + $0x18] sm:$0xff]  ;;  %v3630_v15 = vld [vmem:[#allocation9 + $0x10] sm:$0xff]   ;;  %v3631_v17 = vld [vmem:[#allocation9 + $0x18] sm:$0xff]   ;;  %3209 = vmatpush3.bf16.msra.mxu0 %v3634_v19 }
  0xab   : > { %3226 = vmatprep.subr.bf16.mxu1 %v3629_v9  ;;  %v4316_v16 = vpack.c.bf16 %v4310_v14, %v4306_v12  ;;  %v4319_v18 = vld [vmem:[%s4283_s26] sm:$0xff]   ;;  %v3635_v20 = vld [vmem:[#allocation11 + $0x8] sm:$0xff]   ;;  %v4341_v32 = vld [vmem:[#allocation8 + $0x8] sm:$0xff]  }
  0xac   : > { %3228 = vmatprep.mubr.msk.bf16.mxu1 %vm464_vm1, %v442_v13  ;;  %3212 = vmatprep.mubr.msk.bf16.mxu0 %vm464_vm1, %v442_v13  ;;  %v3636_v21 = vld [vmem:[#allocation9] sm:$0xff]   ;;  %v3637_v22 = vld [vmem:[#allocation9 + $0x8] sm:$0xff]   ;;  %v4337_v24 = vld [vmem:[#allocation8] sm:$0xff]  }
  0xad   : > { %3210 = vmatprep.subr.bf16.mxu0 %v3635_v20  ;;  %v4326_v23 = vld [vmem:[%s4283_s26 + $0x8] sm:$0xff]   ;;  %v3640_v31 = vld [vmem:[#allocation11 + $0x30] sm:$0xff]   ;;  %v3644_v36 = vld [vmem:[#allocation11 + $0x20] sm:$0xff]  }
  0xae   : > { %3227 = vmatpush3.bf16.msra.mxu1 %v3629_v9  ;;  %3211 = vmatpush3.bf16.msra.mxu0 %v3635_v20  ;;  %v3641_v33 = vld [vmem:[#allocation11 + $0x38] sm:$0xff]   ;;  %v3642_v34 = vld [vmem:[#allocation9 + $0x30] sm:$0xff]   ;;  %v3645_v37 = vld [vmem:[#allocation11 + $0x28] sm:$0xff]  }
  0xaf   : > { %3232 = vmatprep.subr.bf16.mxu1 %v3630_v15  ;;  %3216 = vmatprep.subr.bf16.mxu0 %v3636_v21  ;;  %v3643_v35 = vld [vmem:[#allocation9 + $0x38] sm:$0xff]   ;;  %v3646_v38 = vld [vmem:[#allocation9 + $0x20] sm:$0xff]   ;;  %v3647_v39 = vld [vmem:[#allocation9 + $0x28] sm:$0xff]  }
  0xb0   : > { %v3648_v50 = vld [vmem:[#allocation11 + $0x40] sm:$0xff]   ;;  %v3649_v51 = vld [vmem:[#allocation11 + $0x50] sm:$0xff]   ;;  %v3650_v52 = vld [vmem:[#allocation11 + $0x48] sm:$0xff]  }
  0xb1   : > { %3229 = vmatmul.mubr.msk.bf16.vlgmr.msra.gmra.mrb[0].mxu1 %vm464_vm1, %v4316_v16  ;;  %3213 = vmatmul.mubr.msk.bf16.vlgmr.msra.gmra.mrb[0].mxu0 %vm464_vm1, %v4316_v16  ;;  %v3651_v53 = vld [vmem:[#allocation11 + $0x58] sm:$0xff]   ;;  %v3652_v54 = vld [vmem:[#allocation9 + $0x50] sm:$0xff]   ;;  %v3654_v55 = vld [vmem:[#allocation9 + $0x40] sm:$0xff]  }
  0xb2   : > { %3233 = vmatpush3.bf16.msra.mxu1 %v3630_v15  ;;  %3236 = vmatprep.mubr.msk.bf16.mxu1 %vm464_vm1, %v4319_v18  ;;  %v2976_v56 = vld [vmem:[%s4625_s5 + $0x1] ss:$0 sm:$0xff] }
  0xb3   : > { %3234 = vmatprep.subr.bf16.mxu1 %v3631_v17  ;;  %3217 = vmatpush3.bf16.msra.mxu0 %v3636_v21 }
  0xb4   : > { %3220 = vmatprep.mubr.msk.bf16.mxu0 %vm464_vm1, %v4319_v18  ;;  %3218 = vmatprep.subr.bf16.mxu0 %v3637_v22 }
  0xb6   : > { %3235 = vmatpush3.bf16.msra.mxu1 %v3631_v17 }
  0xb7   : > { %3219 = vmatpush3.bf16.msra.mxu0 %v3637_v22  ;;  %3248 = vmatprep.subr.bf16.mxu1 %v3644_v36 }
  0xbd   : > { %3237 = vmatmul.mubr.msk.bf16.vlgmr.msra.gmra.mrb[0].mxu1 %vm464_vm1, %v4326_v23  ;;  %3221 = vmatmul.mubr.msk.bf16.vlgmr.msra.gmra.mrb[0].mxu0 %vm464_vm1, %v4326_v23 }
  0xbe   : > { %3252 = vmatprep.mubr.msk.bf16.mxu1 %vm464_vm1, %v442_v13  ;;  %3244 = vmatprep.mubr.msk.bf16.mxu0 %vm464_vm1, %v4337_v24 }
  0xbf   : > { %3249 = vmatpush3.bf16.msra.mxu1 %v3644_v36 }
  0xc0   : > { %3250 = vmatprep.subr.bf16.mxu1 %v3645_v37 }
  0xc3   : > { %3251 = vmatpush3.bf16.msra.mxu1 %v3645_v37 }
  0xc4   : > { %3256 = vmatprep.subr.bf16.mxu1 %v3646_v38 }
  0xc6   : > { %3253 = vmatmul.mubr.msk.bf16.vlgmr.msra.gmra.mrb[4].mxu1 %vm464_vm1, %v4316_v16 }
  0xc7   : > { %3260 = vmatprep.mubr.msk.bf16.mxu1 %vm464_vm1, %v4319_v18  ;;  %3257 = vmatpush3.bf16.msra.mxu1 %v3646_v38 }
  0xc8   : > { %3258 = vmatprep.subr.bf16.mxu1 %v3647_v39 }
  0xcb   : > { %3259 = vmatpush3.bf16.msra.mxu1 %v3647_v39  ;;  %v3657_v39 = vld [vmem:[#allocation11 + $0x70] sm:$0xff]  }
  0xd2   : > { %3261 = vmatmul.mubr.msk.bf16.vlgmr.msra.gmra.mrb[4].mxu1 %vm464_vm1, %v4326_v23 }
  0xd3   : > { %3284 = vmatprep.mubr.msk.bf16.mxu1 %vm464_vm1, %v4337_v24 }
 0x190   : > { %v3238_v25 = vpop.f32.mrb[0].mxu1 }
 0x191   : > { %v714_v26 = vpop.f32.mrb[1].mxu1 }
 0x192   : > { %v3239_v27 = vpop.f32.mrb[2].mxu1 }
 0x193   : > { %v730_v28 = vpack.c.bf16 %v3239_v27, %v3238_v25  ;;  %v717_v29 = vpop.f32.mrb[3].mxu1 }
 0x194   : > { %v729_v30 = vpack.c.bf16 %v717_v29, %v714_v26 }
 0x196   : > { %3240 = vmatprep.subr.bf16.mxu0 %v729_v30 }
 0x197   : > { %3241 = vmatpush3.bf16.msra.mxu0 %v729_v30  ;;  %v3653_v30 = vld [vmem:[#allocation9 + $0x58] sm:$0xff]  }
 0x198   : > { %3242 = vmatprep.subr.bf16.mxu0 %v730_v28 }
 0x19b   : > { %3243 = vmatpush3.bf16.msra.mxu0 %v730_v28 }
 0x19c   : > { %3264 = vmatprep.subr.bf16.mxu0 %v3640_v31 }
 0x19e   : > { %3245 = vmatmul.mubr.msk.bf16.vlgmr.msra.gmra.mrb[0].mxu0 %vm464_vm1, %v4341_v32 }
 0x19f   : > { %3265 = vmatpush3.bf16.msra.mxu0 %v3640_v31  ;;  %3268 = vmatprep.mubr.msk.bf16.mxu0 %vm464_vm1, %v442_v13  ;;  %v3655_v31 = vld [vmem:[#allocation9 + $0x48] sm:$0xff]  }
 0x1a0   : > { %3266 = vmatprep.subr.bf16.mxu0 %v3641_v33 }
 0x1a3   : > { %3267 = vmatpush3.bf16.msra.mxu0 %v3641_v33 }
 0x1a4   : > { %3272 = vmatprep.subr.bf16.mxu0 %v3642_v34 }
 0x1a6   : > { %3269 = vmatmul.mubr.msk.bf16.vlgmr.msra.gmra.mrb[4].mxu0 %vm464_vm1, %v4316_v16 }
 0x1a7   : > { %3273 = vmatpush3.bf16.msra.mxu0 %v3642_v34  ;;  %3276 = vmatprep.mubr.msk.bf16.mxu0 %vm464_vm1, %v4319_v18 }
 0x1a8   : > { %3274 = vmatprep.subr.bf16.mxu0 %v3643_v35 }
 0x1ab   : > { %3275 = vmatpush3.bf16.msra.mxu0 %v3643_v35 }
 0x1ac   : > { %3288 = vmatprep.subr.bf16.mxu0 %v3648_v50 }
 0x1b2   : > { %3277 = vmatmul.mubr.msk.bf16.vlgmr.msra.gmra.mrb[4].mxu0 %vm464_vm1, %v4326_v23 }
 0x1b3   : > { %3289 = vmatpush3.bf16.msra.mxu0 %v3648_v50 }
 0x1b4   : > { %3290 = vmatprep.subr.bf16.mxu0 %v3650_v52 }
 0x1b7   : > { %3291 = vmatpush3.bf16.msra.mxu0 %v3650_v52  ;;  %v3661_v52 = vld [vmem:[#allocation9 + $0x70] sm:$0xff]  }
 0x1b8   : > { %3296 = vmatprep.subr.bf16.mxu0 %v3654_v55 }
 0x271   : > { %v4360_v40 = vpop.f32.mrb[0].mxu0 }
 0x272   : > { %v4362_v41 = vpop.f32.mrb[1].mxu0 }
 0x273   : > { %v4364_v42 = vpop.f32.mrb[2].mxu0 }
 0x274   : > { %v4366_v43 = vpop.f32.mrb[3].mxu0 }
 0x285   : > { %v3278_v44 = vpop.f32.mrb[4].mxu0 }
 0x286   : > { %v1084_v45 = vpop.f32.mrb[5].mxu0 }
 0x287   : > { %v3279_v46 = vpop.f32.mrb[6].mxu0 }
 0x288   : > { %v1100_v47 = vpack.c.bf16 %v3279_v46, %v3278_v44  ;;  %v1087_v48 = vpop.f32.mrb[7].mxu0  ;;  %v3659_v44 = vld [vmem:[#allocation11 + $0x78] sm:$0xff]  }
 0x289   : > { %v1099_v49 = vpack.c.bf16 %v1087_v48, %v1084_v45  ;;  %v4393_v45 = vld [vmem:[#allocation2 + $0x20] sm:$0xff]  ;;  %v4395_v46 = vld [vmem:[#allocation2 + $0x28] sm:$0xff]  ;;  %v4401_v48 = vld [vmem:[#allocation2 + $0x30] sm:$0xff] }
 0x28b   : > { %3280 = vmatprep.subr.bf16.mxu1 %v1099_v49 }
 0x28c   : > { %3281 = vmatpush3.bf16.msra.mxu1 %v1099_v49  ;;  %v4403_v49 = vld [vmem:[#allocation2 + $0x38] sm:$0xff] }
 0x28d   : > { %3282 = vmatprep.subr.bf16.mxu1 %v1100_v47  ;;  %v4407_v50 = vpack.c.bf16 %v4403_v49, %v4401_v48 }
 0x290   : > { %3283 = vmatpush3.bf16.msra.mxu1 %v1100_v47  ;;  %v4399_v47 = vpack.c.bf16 %v4395_v46, %v4393_v45 }
 0x291   : > { %3304 = vmatprep.subr.bf16.mxu1 %v3649_v51 }
 0x293   : > { %3285 = vmatmul.mubr.msk.bf16.vlgmr.msra.gmra.mrb[4].mxu1 %vm464_vm1, %v4341_v32 }
 0x294   : > { %3305 = vmatpush3.bf16.msra.mxu1 %v3649_v51  ;;  %v3660_v51 = vld [vmem:[#allocation9 + $0x60] sm:$0xff]  }
 0x295   : > { %3306 = vmatprep.subr.bf16.mxu1 %v3651_v53 }
 0x298   : > { %3307 = vmatpush3.bf16.msra.mxu1 %v3651_v53  ;;  %v3662_v53 = vld [vmem:[#allocation9 + $0x68] sm:$0xff]  }
 0x299   : > { %3312 = vmatprep.subr.bf16.mxu1 %v3652_v54 }
 0x366   : > { %v3286_v57 = vpop.f32.mrb[4].mxu1 }
 0x367   : > { %v1164_v58 = vadd.f32 %v3286_v57, %v2976_v56  ;;  %v1135_v59 = vpop.f32.mrb[5].mxu1 }
 0x368   : > { %v1162_v60 = vadd.f32 %v2976_v56, %v1135_v59  ;;  %v3287_v61 = vpop.f32.mrb[6].mxu1 }
 0x369   : > { %v2979_v62 = vmul.f32 -1.442695, %v1164_v58  ;;  %v1165_v63 = vadd.f32 %v3287_v61, %v2976_v56  ;;  %v1138_v0 = vpop.f32.mrb[7].mxu1 }
 0x36a   : > { %v2977_v1 = vmul.f32 -1.442695, %v1162_v60  ;;  %v1163_v2 = vadd.f32 %v2976_v56, %v1138_v0  ;;  %v2952_v56 = vld [vmem:[%s4625_s5] ss:$0 sm:$0xff] }
 0x36b   : > { %3682 = vpow2.f32 %v2979_v62  ;;  %v2980_v3 = vmul.f32 -1.442695, %v1165_v63  ;;  %v809_v57 = vadd.f32 %v4360_v40, %v2952_v56  ;;  %v807_v58 = vadd.f32 %v2952_v56, %v4362_v41 }
 0x36c   : > { %3684 = vpow2.f32 %v2977_v1  ;;  %v2978_v4 = vmul.f32 -1.442695, %v1163_v2  ;;  %v810_v59 = vadd.f32 %v4364_v42, %v2952_v56  ;;  %v808_v60 = vadd.f32 %v2952_v56, %v4366_v43  ;;  %v3000_v42 = vld [vmem:[%s4625_s5 + $0x2] ss:$0 sm:$0xff] }
 0x36d   : > { %3686 = vpow2.f32 %v2980_v3  ;;  %v2955_v61 = vmul.f32 -1.442695, %v809_v57  ;;  %v2953_v62 = vmul.f32 -1.442695, %v807_v58 }
 0x36e   : > { %3688 = vpow2.f32 %v2978_v4  ;;  %v2956_v63 = vmul.f32 -1.442695, %v810_v59  ;;  %v2954_v0 = vmul.f32 -1.442695, %v808_v60 }
 0x375   : > { %v3683_v5 = vpop.eup %3682 }
 0x376   : > { %v3685_v6 = vpop.eup %3684  ;;  %v1180_v7 = vadd.f32 1.0, %v3683_v5 }
 0x377   : > { %v3687_v8 = vpop.eup %3686  ;;  %v1178_v9 = vadd.f32 1.0, %v3685_v6 }
 0x378   : > { %v3689_v13 = vpop.eup %3688  ;;  %3690 = vrcp.f32 %v1180_v7  ;;  %v1181_v15 = vadd.f32 1.0, %v3687_v8 }
 0x379   : > { %3692 = vrcp.f32 %v1178_v9  ;;  %v1179_v16 = vadd.f32 1.0, %v3689_v13 }
 0x37a   : > { %3694 = vrcp.f32 %v1181_v15 }
 0x37b   : > { %3696 = vrcp.f32 %v1179_v16 }
 0x37c   : > { %3698 = vpow2.f32 %v2955_v61  ;;  %v3668_v61 = vld [vmem:[#allocation11 + $0x90] sm:$0xff]  }
 0x37d   : > { %3700 = vpow2.f32 %v2953_v62  ;;  %v3669_v62 = vld [vmem:[#allocation11 + $0x98] sm:$0xff]  }
 0x37e   : > { %3702 = vpow2.f32 %v2956_v63  ;;  %v3670_v63 = vld [vmem:[#allocation9 + $0x90] sm:$0xff]  }
 0x37f   : > { %3704 = vpow2.f32 %v2954_v0  ;;  %v3671_v0 = vld [vmem:[#allocation9 + $0x98] sm:$0xff]  }
 0x382   : > { %v3691_v17 = vpop.eup %3690 }
 0x383   : > { %v3693_v19 = vpop.eup %3692  ;;  %v1192_v22 = vmul.f32 %v3691_v17, %v4306_v12 }
 0x384   : > { %v3695_v20 = vpop.eup %3694  ;;  %v1190_v26 = vmul.f32 %v3693_v19, %v4302_v10 }
 0x385   : > { %v3697_v21 = vpop.eup %3696  ;;  %v1193_v25 = vmul.f32 %v3695_v20, %v4310_v14 }
 0x386   : > { %v1191_v27 = vmul.f32 %v3697_v21, %v4304_v11  ;;  %v3699_v1 = vpop.eup %3698 }
 0x387   : > { %v1195_v28 = vpack.c.bf16 %v1193_v25, %v1192_v22  ;;  %v3701_v2 = vpop.eup %3700  ;;  %v825_v5 = vadd.f32 1.0, %v3699_v1 }
 0x388   : > { %v1194_v29 = vpack.c.bf16 %v1191_v27, %v1190_v26  ;;  %v3703_v3 = vpop.eup %3702  ;;  %v823_v40 = vadd.f32 1.0, %v3701_v2 }
 0x389   : > { %v3705_v4 = vpop.eup %3704  ;;  %v826_v6 = vadd.f32 1.0, %v3703_v3  ;;  %3706 = vrcp.f32 %v825_v5 }
 0x38a   : > { %3292 = vmatprep.mubr.msk.bf16.mxu0 %vm464_vm1, %v1194_v29  ;;  %3308 = vmatprep.mubr.msk.bf16.mxu1 %vm464_vm1, %v1194_v29  ;;  %v824_v41 = vadd.f32 1.0, %v3705_v4  ;;  %3708 = vrcp.f32 %v823_v40 }
 0x38b   : > { %3293 = vmatmul.mubr.msk.bf16.vlgmr.msra.gmra.mrb[8].mxu0 %vm464_vm1, %v1195_v28  ;;  %3309 = vmatmul.mubr.msk.bf16.vlgmr.msra.gmra.mrb[8].mxu1 %vm464_vm1, %v1195_v28  ;;  %3710 = vrcp.f32 %v826_v6 }
 0x38c   : > { %3313 = vmatpush3.bf16.msra.mxu1 %v3652_v54  ;;  %3316 = vmatprep.mubr.msk.bf16.mxu1 %vm464_vm1, %v4319_v18  ;;  %v3663_v54 = vld [vmem:[#allocation9 + $0x78] sm:$0xff]   ;;  %3712 = vrcp.f32 %v824_v41 }
 0x38d   : > { %3314 = vmatprep.subr.bf16.mxu1 %v3653_v30  ;;  %3297 = vmatpush3.bf16.msra.mxu0 %v3654_v55  ;;  %v4417_v55 = vld [vmem:[#allocation11 + $0x80] sm:$0xff]  }
 0x38e   : > { %3298 = vmatprep.subr.bf16.mxu0 %v3655_v31  ;;  %3300 = vmatprep.mubr.msk.bf16.mxu0 %vm464_vm1, %v4319_v18  ;;  %v3656_v18 = vld [vmem:[#allocation11 + $0x60] sm:$0xff]  }
 0x390   : > { %3315 = vmatpush3.bf16.msra.mxu1 %v3653_v30 }
 0x391   : > { %3299 = vmatpush3.bf16.msra.mxu0 %v3655_v31  ;;  %3328 = vmatprep.subr.bf16.mxu1 %v3656_v18 }
 0x393   : > { %v3707_v19 = vpop.eup %3706 }
 0x394   : > { %v3709_v20 = vpop.eup %3708  ;;  %v1543_v25 = vsub.f32 1.0, %v3707_v19  ;;  %v1539_v29 = vmul.f32 %v3707_v19, %v4306_v12 }
 0x395   : > { %v3711_v21 = vpop.eup %3710  ;;  %v1541_v27 = vsub.f32 1.0, %v3709_v20 }
 0x396   : > { %v3713_v22 = vpop.eup %3712  ;;  %v1544_v31 = vsub.f32 1.0, %v3711_v21 }
 0x397   : > { %3317 = vmatmul.mubr.msk.bf16.vlgmr.msra.gmra.mrb[8].mxu1 %vm464_vm1, %v4326_v23  ;;  %3301 = vmatmul.mubr.msk.bf16.vlgmr.msra.gmra.mrb[8].mxu0 %vm464_vm1, %v4326_v23  ;;  %v3658_v23 = vld [vmem:[#allocation11 + $0x68] sm:$0xff]  }
 0x398   : > { %3324 = vmatprep.mubr.msk.bf16.mxu0 %vm464_vm1, %v4337_v24  ;;  %3329 = vmatpush3.bf16.msra.mxu1 %v3656_v18 }
 0x399   : > { %3330 = vmatprep.subr.bf16.mxu1 %v3658_v23  ;;  %3332 = vmatprep.mubr.msk.bf16.mxu1 %vm464_vm1, %v4399_v47 }
 0x39c   : > { %3331 = vmatpush3.bf16.msra.mxu1 %v3658_v23  ;;  %v1538_v23 = vmul.f32 %v3713_v22, %v4304_v11  ;;  %v3666_v11 = vld [vmem:[#allocation9 + $0x80] sm:$0xff]  }
 0x39d   : > { %3336 = vmatprep.subr.bf16.mxu1 %v3660_v51 }
 0x39f   : > { %3333 = vmatmul.mubr.msk.bf16.vlgmr.msra.gmra.mrb[12].mxu1 %vm464_vm1, %v4407_v50 }
 0x3a0   : > { %3337 = vmatpush3.bf16.msra.mxu1 %v3660_v51 }
 0x3a1   : > { %3338 = vmatprep.subr.bf16.mxu1 %v3662_v53 }
 0x3a4   : > { %3339 = vmatpush3.bf16.msra.mxu1 %v3662_v53 }
 0x46a   : > { %v3318_v33 = vpop.f32.mrb[8].mxu1 }
 0x46b   : > { %v1451_v34 = vpop.f32.mrb[9].mxu1 }
 0x46c   : > { %v3319_v35 = vpop.f32.mrb[10].mxu1 }
 0x46d   : > { %v1467_v36 = vpack.c.bf16 %v3319_v35, %v3318_v33  ;;  %v1454_v37 = vpop.f32.mrb[11].mxu1 }
 0x46e   : > { %v1466_v38 = vpack.c.bf16 %v1454_v37, %v1451_v34  ;;  %v1537_v34 = vmul.f32 %v3709_v20, %v4302_v10 }
 0x470   : > { %3320 = vmatprep.subr.bf16.mxu0 %v1466_v38 }
 0x471   : > { %3321 = vmatpush3.bf16.msra.mxu0 %v1466_v38  ;;  %v1540_v38 = vmul.f32 %v3711_v21, %v4310_v14  ;;  %v3665_v14 = vld [vmem:[#allocation11 + $0x88] sm:$0xff]  }
 0x472   : > { %3322 = vmatprep.subr.bf16.mxu0 %v1467_v36 }
 0x475   : > { %3323 = vmatpush3.bf16.msra.mxu0 %v1467_v36  ;;  %v1542_v36 = vsub.f32 1.0, %v3713_v22 }
 0x476   : > { %3344 = vmatprep.subr.bf16.mxu0 %v3657_v39 }
 0x478   : > { %3325 = vmatmul.mubr.msk.bf16.vlgmr.msra.gmra.mrb[8].mxu0 %vm464_vm1, %v4341_v32 }
 0x479   : > { %3345 = vmatpush3.bf16.msra.mxu0 %v3657_v39  ;;  %3348 = vmatprep.mubr.msk.bf16.mxu0 %vm464_vm1, %v4399_v47 }
 0x47a   : > { %3346 = vmatprep.subr.bf16.mxu0 %v3659_v44 }
 0x47d   : > { %3347 = vmatpush3.bf16.msra.mxu0 %v3659_v44 }
 0x47e   : > { %3352 = vmatprep.subr.bf16.mxu0 %v3661_v52 }
 0x480   : > { %3349 = vmatmul.mubr.msk.bf16.vlgmr.msra.gmra.mrb[12].mxu0 %vm464_vm1, %v4407_v50 }
 0x481   : > { %3353 = vmatpush3.bf16.msra.mxu0 %v3661_v52 }
 0x482   : > { %3354 = vmatprep.subr.bf16.mxu0 %v3663_v54 }
 0x485   : > { %3355 = vmatpush3.bf16.msra.mxu0 %v3663_v54  ;;  %v3667_v54 = vld [vmem:[#allocation9 + $0x88] sm:$0xff]  }
 0x486   : > { %3368 = vmatprep.subr.bf16.mxu0 %v4417_v55 }
 0x54b   : > { %v3326_v43 = vpop.f32.mrb[8].mxu0 }
 0x54c   : > { %v1531_v7 = vadd.f32 %v3326_v43, %v3000_v42  ;;  %v1502_v8 = vpop.f32.mrb[9].mxu0  ;;  %v3673_v43 = vld [vmem:[#allocation11 + $0xb0] sm:$0xff]  }
 0x54d   : > { %v1529_v9 = vadd.f32 %v3000_v42, %v1502_v8  ;;  %v3327_v13 = vpop.f32.mrb[10].mxu0  ;;  %v3675_v8 = vld [vmem:[#allocation11 + $0xb8] sm:$0xff]  }
 0x54e   : > { %3714 = vtanh.f32 %v1531_v7  ;;  %v1532_v15 = vadd.f32 %v3327_v13, %v3000_v42  ;;  %v1505_v16 = vpop.f32.mrb[11].mxu0  ;;  %v3674_v7 = vld [vmem:[#allocation11 + $0xa8] sm:$0xff]   ;;  %v3677_v13 = vld [vmem:[#allocation9 + $0xb0] sm:$0xff]  }
 0x54f   : > { %3716 = vtanh.f32 %v1529_v9  ;;  %v1530_v17 = vadd.f32 %v3000_v42, %v1505_v16  ;;  %v3672_v42 = vld [vmem:[#allocation11 + $0xa0] sm:$0xff]  }
 0x550   : > { %3718 = vtanh.f32 %v1532_v15  ;;  %v3676_v9 = vld [vmem:[#allocation9 + $0xa0] sm:$0xff]   ;;  %v3044_v15 = vld [vmem:[%s4625_s5 + $0x4] ss:$0 sm:$0xff] }
 0x551   : > { %3720 = vtanh.f32 %v1530_v17 }
 0x558   : > { %v3715_v26 = vpop.eup %3714 }
 0x559   : > { %v3717_v28 = vpop.eup %3716  ;;  %v1547_v30 = vmul.f32 %v3715_v26, %v1543_v25 }
 0x55a   : > { %v3719_v33 = vpop.eup %3718  ;;  %v1545_v35 = vmul.f32 %v3717_v28, %v1541_v27 }
 0x55b   : > { %v3721_v37 = vpop.eup %3720  ;;  %v1551_v18 = vadd.f32 %v1547_v30, %v1539_v29  ;;  %v1548_v39 = vmul.f32 %v3719_v33, %v1544_v31 }
 0x55c   : > { %v1549_v44 = vadd.f32 %v1545_v35, %v1537_v34  ;;  %v1546_v51 = vmul.f32 %v3721_v37, %v1542_v36 }
 0x55d   : > { %1555 = vst.msk [vmem:[#allocation2 + $0x10] sm:$0xff] %vm464_vm1, %v1551_v18  ;;  %v1552_v52 = vadd.f32 %v1548_v39, %v1540_v38 }
 0x55e   : > { %1553 = vst.msk [vmem:[#allocation2] sm:$0xff] %vm464_vm1, %v1549_v44  ;;  %v1550_v12 = vadd.f32 %v1546_v51, %v1538_v23 }
 0x55f   : > { %1556 = vst.msk [vmem:[#allocation2 + $0x18] sm:$0xff] %vm464_vm1, %v1552_v52  ;;  %v4437_v10 = vpack.c.bf16 %v1552_v52, %v1551_v18 }
 0x560   : > { %1554 = vst.msk [vmem:[#allocation2 + $0x8] sm:$0xff] %vm464_vm1, %v1550_v12  ;;  %v4440_v53 = vpack.c.bf16 %v1550_v12, %v1549_v44 }
 0x562   : > { %3340 = vmatprep.mubr.msk.bf16.mxu1 %vm464_vm1, %v4440_v53  ;;  %3356 = vmatprep.mubr.msk.bf16.mxu0 %vm464_vm1, %v4440_v53 }
 0x563   : > { %3341 = vmatmul.mubr.msk.bf16.vlgmr.msra.gmra.mrb[12].mxu1 %vm464_vm1, %v4437_v10  ;;  %3357 = vmatmul.mubr.msk.bf16.vlgmr.msra.gmra.mrb[12].mxu0 %vm464_vm1, %v4437_v10 }
 0x564   : > { %3369 = vmatpush3.bf16.msra.mxu0 %v4417_v55  ;;  %3372 = vmatprep.mubr.msk.bf16.mxu0 %vm464_vm1, %v4399_v47 }
 0x565   : > { %3370 = vmatprep.subr.bf16.mxu0 %v3665_v14  ;;  %3364 = vmatprep.mubr.msk.bf16.mxu1 %vm464_vm1, %v4337_v24 }
 0x568   : > { %3371 = vmatpush3.bf16.msra.mxu0 %v3665_v14 }
 0x569   : > { %3376 = vmatprep.subr.bf16.mxu0 %v3666_v11 }
 0x56b   : > { %3373 = vmatmul.mubr.msk.bf16.vlgmr.msra.gmra.mrb[16].mxu0 %vm464_vm1, %v4407_v50 }
 0x56c   : > { %3380 = vmatprep.mubr.msk.bf16.mxu0 %vm464_vm1, %v4440_v53  ;;  %3377 = vmatpush3.bf16.msra.mxu0 %v3666_v11 }
 0x56d   : > { %3378 = vmatprep.subr.bf16.mxu0 %v3667_v54 }
 0x570   : > { %3379 = vmatpush3.bf16.msra.mxu0 %v3667_v54 }
 0x577   : > { %3381 = vmatmul.mubr.msk.bf16.vlgmr.msra.gmra.mrb[16].mxu0 %vm464_vm1, %v4437_v10 }
 0x578   : > { %3404 = vmatprep.mubr.msk.bf16.mxu0 %vm464_vm1, %v4337_v24 }
 0x636   : > { %v3358_v55 = vpop.f32.mrb[12].mxu0 }
 0x637   : > { %v1827_v56 = vpop.f32.mrb[13].mxu0 }
 0x638   : > { %v3359_v57 = vpop.f32.mrb[14].mxu0 }
 0x639   : > { %v1843_v58 = vpack.c.bf16 %v3359_v57, %v3358_v55  ;;  %v1830_v59 = vpop.f32.mrb[15].mxu0  ;;  %v3679_v57 = vld [vmem:[#allocation9 + $0xb8] sm:$0xff]  }
 0x63a   : > { %v1842_v60 = vpack.c.bf16 %v1830_v59, %v1827_v56  ;;  %v3678_v56 = vld [vmem:[#allocation9 + $0xa8] sm:$0xff]  }
 0x63c   : > { %3360 = vmatprep.subr.bf16.mxu1 %v1842_v60 }
 0x63d   : > { %3361 = vmatpush3.bf16.msra.mxu1 %v1842_v60 }
 0x63e   : > { %3362 = vmatprep.subr.bf16.mxu1 %v1843_v58 }
 0x641   : > { %3363 = vmatpush3.bf16.msra.mxu1 %v1843_v58 }
 0x642   : > { %3384 = vmatprep.subr.bf16.mxu1 %v3668_v61 }
 0x644   : > { %3365 = vmatmul.mubr.msk.bf16.vlgmr.msra.gmra.mrb[12].mxu1 %vm464_vm1, %v4341_v32 }
 0x645   : > { %3385 = vmatpush3.bf16.msra.mxu1 %v3668_v61  ;;  %3388 = vmatprep.mubr.msk.bf16.mxu1 %vm464_vm1, %v4399_v47 }
 0x646   : > { %3386 = vmatprep.subr.bf16.mxu1 %v3669_v62 }
 0x649   : > { %3387 = vmatpush3.bf16.msra.mxu1 %v3669_v62 }
 0x64a   : > { %3392 = vmatprep.subr.bf16.mxu1 %v3670_v63 }
 0x64c   : > { %3389 = vmatmul.mubr.msk.bf16.vlgmr.msra.gmra.mrb[16].mxu1 %vm464_vm1, %v4407_v50 }
 0x64d   : > { %3396 = vmatprep.mubr.msk.bf16.mxu1 %vm464_vm1, %v4440_v53  ;;  %3393 = vmatpush3.bf16.msra.mxu1 %v3670_v63  ;;  %v3020_v63 = vld [vmem:[%s4625_s5 + $0x3] ss:$0 sm:$0xff] }
 0x64e   : > { %3394 = vmatprep.subr.bf16.mxu1 %v3671_v0 }
 0x651   : > { %3395 = vmatpush3.bf16.msra.mxu1 %v3671_v0 }
 0x652   : > { %3408 = vmatprep.subr.bf16.mxu1 %v3672_v42 }
 0x658   : > { %3397 = vmatmul.mubr.msk.bf16.vlgmr.msra.gmra.mrb[16].mxu1 %vm464_vm1, %v4437_v10 }
 0x659   : > { %3409 = vmatpush3.bf16.msra.mxu1 %v3672_v42 }
 0x65a   : > { %3410 = vmatprep.subr.bf16.mxu1 %v3674_v7 }
 0x65d   : > { %3411 = vmatpush3.bf16.msra.mxu1 %v3674_v7 }
 0x65e   : > { %3416 = vmatprep.subr.bf16.mxu1 %v3676_v9 }
 0x717   : > { %v4473_v1 = vpop.f32.mrb[12].mxu1 }
 0x718   : > { %v4475_v47 = vpop.f32.mrb[13].mxu1  ;;  %v1907_v0 = vadd.f32 %v4473_v1, %v3020_v63 }
 0x719   : > { %v4477_v2 = vpop.f32.mrb[14].mxu1 }
 0x71a   : > { %v4479_v3 = vpop.f32.mrb[15].mxu1 }
 0x72b   : > { %v3398_v4 = vpop.f32.mrb[16].mxu1 }
 0x72c   : > { %v2182_v5 = vpop.f32.mrb[17].mxu1 }
 0x72d   : > { %v3399_v50 = vpop.f32.mrb[18].mxu1 }
 0x72e   : > { %v2198_v40 = vpack.c.bf16 %v3399_v50, %v3398_v4  ;;  %v2185_v6 = vpop.f32.mrb[19].mxu1  ;;  %v1908_v4 = vadd.f32 %v4477_v2, %v3020_v63  ;;  %v3023_v50 = vmul.f32 -1.442695, %v1907_v0  ;;  %v3068_v2 = vld [vmem:[%s4625_s5 + $0x5] ss:$0 sm:$0xff] }
 0x72f   : > { %v2197_v41 = vpack.c.bf16 %v2185_v6, %v2182_v5  ;;  %v1906_v5 = vadd.f32 %v3020_v63, %v4479_v3  ;;  %v2747_v0 = vld [vmem:[#allocation2] sm:$0xff] (!%p3074_p9) }
 0x730   : > { %v3024_v6 = vmul.f32 -1.442695, %v1908_v4  ;;  %v2749_v4 = vld [vmem:[#allocation2 + $0x10] sm:$0xff] (!%p3074_p9)  ;;  %2755 = vst.msk [vmem:[#allocation13] sm:$0xff] (!%p3074_p9), %vm464_vm1, %v2747_v0 }
 0x731   : > { %3400 = vmatprep.subr.bf16.mxu0 %v2197_v41  ;;  %2757 = vst.msk [vmem:[#allocation13 + $0x10] sm:$0xff] (!%p3074_p9), %vm464_vm1, %v2749_v4 }
 0x732   : > { %3401 = vmatpush3.bf16.msra.mxu0 %v2197_v41  ;;  %v3022_v41 = vmul.f32 -1.442695, %v1906_v5  ;;  %v2750_v5 = vld [vmem:[#allocation2 + $0x18] sm:$0xff] (!%p3074_p9) }
 0x733   : > { %3402 = vmatprep.subr.bf16.mxu0 %v2198_v40  ;;  %2758 = vst.msk [vmem:[#allocation13 + $0x18] sm:$0xff] (!%p3074_p9), %vm464_vm1, %v2750_v5 }
 0x736   : > { %3403 = vmatpush3.bf16.msra.mxu0 %v2198_v40 }
 0x737   : > { %3424 = vmatprep.subr.bf16.mxu0 %v3673_v43 }
 0x739   : > { %3405 = vmatmul.mubr.msk.bf16.vlgmr.msra.gmra.mrb[16].mxu0 %vm464_vm1, %v4341_v32 }
 0x73a   : > { %3425 = vmatpush3.bf16.msra.mxu0 %v3673_v43 }
 0x73b   : > { %3426 = vmatprep.subr.bf16.mxu0 %v3675_v8 }
 0x73e   : > { %3427 = vmatpush3.bf16.msra.mxu0 %v3675_v8 }
 0x73f   : > { %3432 = vmatprep.subr.bf16.mxu0 %v3677_v13 }
 0x80c   : > { %v3406_v16 = vpop.f32.mrb[16].mxu0 }
 0x80d   : > { %v2262_v17 = vadd.f32 %v3406_v16, %v3044_v15  ;;  %v2233_v19 = vpop.f32.mrb[17].mxu0 }
 0x80e   : > { %v2260_v20 = vadd.f32 %v3044_v15, %v2233_v19  ;;  %v3407_v21 = vpop.f32.mrb[18].mxu0 }
 0x80f   : > { %v3047_v22 = vmul.f32 -1.442695, %v2262_v17  ;;  %v2263_v25 = vadd.f32 %v3407_v21, %v3044_v15  ;;  %v2236_v26 = vpop.f32.mrb[19].mxu0 }
 0x810   : > { %v3045_v27 = vmul.f32 -1.442695, %v2260_v20  ;;  %v2261_v28 = vadd.f32 %v3044_v15, %v2236_v26 }
 0x811   : > { %3722 = vpow2.f32 %v3047_v22  ;;  %v3048_v29 = vmul.f32 -1.442695, %v2263_v25 }
 0x812   : > { %3724 = vpow2.f32 %v3045_v27  ;;  %v3046_v30 = vmul.f32 -1.442695, %v2261_v28 }
 0x813   : > { %3726 = vpow2.f32 %v3048_v29 }
 0x814   : > { %3728 = vpow2.f32 %v3046_v30 }
 0x81b   : > { %v3723_v31 = vpop.eup %3722 }
 0x81c   : > { %v3725_v33 = vpop.eup %3724  ;;  %v2278_v34 = vadd.f32 1.0, %v3723_v31 }
 0x81d   : > { %v3727_v35 = vpop.eup %3726  ;;  %v2276_v36 = vadd.f32 1.0, %v3725_v33 }
 0x81e   : > { %v3729_v37 = vpop.eup %3728  ;;  %3730 = vrcp.f32 %v2278_v34  ;;  %v2279_v38 = vadd.f32 1.0, %v3727_v35 }
 0x81f   : > { %3732 = vrcp.f32 %v2276_v36  ;;  %v2277_v18 = vadd.f32 1.0, %v3729_v37 }
 0x820   : > { %3734 = vrcp.f32 %v2279_v38 }
 0x821   : > { %3736 = vrcp.f32 %v2277_v18 }
 0x822   : > { %3738 = vpow2.f32 %v3023_v50 }
 0x828   : > { %v3731_v39 = vpop.eup %3730 }
 0x829   : > { %v3733_v23 = vpop.eup %3732  ;;  %v2290_v52 = vmul.f32 %v3731_v39, %v4401_v48 }
 0x82a   : > { %v3735_v44 = vpop.eup %3734  ;;  %v2288_v14 = vmul.f32 %v3733_v23, %v4393_v45 }
 0x82b   : > { %v3737_v51 = vpop.eup %3736  ;;  %v2291_v12 = vmul.f32 %v3735_v44, %v4403_v49 }
 0x82c   : > { %v2289_v11 = vmul.f32 %v3737_v51, %v4395_v46  ;;  %v3739_v42 = vpop.eup %3738 }
 0x82d   : > { %v2293_v54 = vpack.c.bf16 %v2291_v12, %v2290_v52 }
 0x82e   : > { %v2292_v55 = vpack.c.bf16 %v2289_v11, %v2288_v14 }
 0x830   : > { %3412 = vmatprep.mubr.msk.bf16.mxu1 %vm464_vm1, %v2292_v55  ;;  %3428 = vmatprep.mubr.msk.bf16.mxu0 %vm464_vm1, %v2292_v55 }
 0x831   : > { %3413 = vmatmul.mubr.msk.bf16.vlgmr.msra.gmra.mrb[20].mxu1 %vm464_vm1, %v2293_v54  ;;  %3429 = vmatmul.mubr.msk.bf16.vlgmr.msra.gmra.mrb[20].mxu0 %vm464_vm1, %v2293_v54 }
 0x832   : > { %3420 = vmatprep.mubr.msk.bf16.mxu1 %vm464_vm1, %v4440_v53  ;;  %3436 = vmatprep.mubr.msk.bf16.mxu0 %vm464_vm1, %v4440_v53 }
 0x833   : > { %3417 = vmatpush3.bf16.msra.mxu1 %v3676_v9  ;;  %3433 = vmatpush3.bf16.msra.mxu0 %v3677_v13  ;;  %v1923_v9 = vadd.f32 1.0, %v3739_v42 }
 0x834   : > { %3418 = vmatprep.subr.bf16.mxu1 %v3678_v56  ;;  %3434 = vmatprep.subr.bf16.mxu0 %v3679_v57 }
 0x837   : > { %3419 = vmatpush3.bf16.msra.mxu1 %v3678_v56  ;;  %3435 = vmatpush3.bf16.msra.mxu0 %v3679_v57 }
 0x83d   : > { %3421 = vmatmul.mubr.msk.bf16.vlgmr.msra.gmra.mrb[20].mxu1 %vm464_vm1, %v4437_v10  ;;  %3437 = vmatmul.mubr.msk.bf16.vlgmr.msra.gmra.mrb[20].mxu0 %vm464_vm1, %v4437_v10  ;;  %v3680_v10 = vld [vmem:[%s4626_s6] sm:$0xff]  }
 0x83e   : > { %3444 = vmatprep.mubr.msk.bf16.mxu1 %vm464_vm1, %v4337_v24  ;;  %v3681_v24 = vld [vmem:[%s4626_s6 + $0x8] sm:$0xff]   ;;  %3448 = vmatprep.subr.bf16.mxu0 %v3680_v10 }
 0x83f   : > { %3449 = vmatpush3.bf16.msra.mxu0 %v3680_v10 }
 0x840   : > { %3450 = vmatprep.subr.bf16.mxu0 %v3681_v24 }
 0x843   : > { %3451 = vmatpush3.bf16.msra.mxu0 %v3681_v24 }
 0x910   : > { %v3438_v58 = vpop.f32.mrb[20].mxu0 }
 0x911   : > { %v2549_v59 = vpop.f32.mrb[21].mxu0 }
 0x912   : > { %v3439_v60 = vpop.f32.mrb[22].mxu0 }
 0x913   : > { %v2565_v61 = vpack.c.bf16 %v3439_v60, %v3438_v58  ;;  %v2552_v53 = vpop.f32.mrb[23].mxu0  ;;  %v3069_v58 = vld [vmem:[%s4627_s7] ss:$0 sm:$0xff] }
 0x914   : > { %v2564_v62 = vpack.c.bf16 %v2552_v53, %v2549_v59 }
 0x916   : > { %3440 = vmatprep.subr.bf16.mxu1 %v2564_v62 }
 0x917   : > { %3441 = vmatpush3.bf16.msra.mxu1 %v2564_v62 }
 0x918   : > { %3442 = vmatprep.subr.bf16.mxu1 %v2565_v61 }
 0x91b   : > { %3443 = vmatpush3.bf16.msra.mxu1 %v2565_v61 }
 0x91e   : > { %3445 = vmatmul.mubr.msk.bf16.vlgmr.msra.gmra.mrb[20].mxu1 %vm464_vm1, %v4341_v32  ;;  %v1905_v32 = vadd.f32 %v3020_v63, %v4475_v47 }
 0x920   : > { %v3021_v40 = vmul.f32 -1.442695, %v1905_v32  ;;  %v2748_v32 = vld [vmem:[#allocation2 + $0x8] sm:$0xff] (!%p3074_p9) }
 0x921   : > { %2756 = vst.msk [vmem:[#allocation13 + $0x8] sm:$0xff] (!%p3074_p9), %vm464_vm1, %v2748_v32 }
 0x922   : > { %3740 = vpow2.f32 %v3021_v40 }
 0x923   : > { %3742 = vpow2.f32 %v3024_v6 }
 0x924   : > { %3744 = vpow2.f32 %v3022_v41 }
 0x925   : > { %3746 = vrcp.f32 %v1923_v9 }
 0x92c   : > { %v3741_v43 = vpop.eup %3740 }
 0x92d   : > { %v3743_v7 = vpop.eup %3742  ;;  %v1921_v1 = vadd.f32 1.0, %v3741_v43 }
 0x92e   : > { %v3745_v8 = vpop.eup %3744  ;;  %v1924_v13 = vadd.f32 1.0, %v3743_v7 }
 0x92f   : > { %v1922_v47 = vadd.f32 1.0, %v3745_v8  ;;  %3748 = vrcp.f32 %v1921_v1  ;;  %v3747_v25 = vpop.eup %3746 }
 0x930   : > { %3750 = vrcp.f32 %v1924_v13  ;;  %v2641_v29 = vsub.f32 1.0, %v3747_v25  ;;  %v2637_v34 = vmul.f32 %v3747_v25, %v4401_v48 }
 0x931   : > { %3752 = vrcp.f32 %v1922_v47 }
 0x939   : > { %v3749_v26 = vpop.eup %3748 }
 0x93a   : > { %v3751_v27 = vpop.eup %3750  ;;  %v2639_v31 = vsub.f32 1.0, %v3749_v26  ;;  %v2635_v38 = vmul.f32 %v3749_v26, %v4393_v45 }
 0x93b   : > { %v3753_v28 = vpop.eup %3752  ;;  %v2642_v36 = vsub.f32 1.0, %v3751_v27  ;;  %v2638_v44 = vmul.f32 %v3751_v27, %v4403_v49 }
 0x93c   : > { %v2640_v39 = vsub.f32 1.0, %v3753_v28  ;;  %v2636_v12 = vmul.f32 %v3753_v28, %v4395_v46 }
 0x9f1   : > { %v3446_v3 = vpop.f32.mrb[20].mxu1 }
 0x9f2   : > { %v2629_v15 = vadd.f32 %v3446_v3, %v3068_v2  ;;  %v2600_v16 = vpop.f32.mrb[21].mxu1 }
 0x9f3   : > { %v2627_v17 = vadd.f32 %v3068_v2, %v2600_v16  ;;  %v3447_v19 = vpop.f32.mrb[22].mxu1 }
 0x9f4   : > { %3754 = vtanh.f32 %v2629_v15  ;;  %v2630_v20 = vadd.f32 %v3447_v19, %v3068_v2  ;;  %v2603_v21 = vpop.f32.mrb[23].mxu1 }
 0x9f5   : > { %3756 = vtanh.f32 %v2627_v17  ;;  %v2628_v22 = vadd.f32 %v3068_v2, %v2603_v21 }
 0x9f6   : > { %3758 = vtanh.f32 %v2630_v20 }
 0x9f7   : > { %3760 = vtanh.f32 %v2628_v22 }
 0x9fe   : > { %v3755_v30 = vpop.eup %3754 }
 0x9ff   : > { %v3757_v33 = vpop.eup %3756  ;;  %v2645_v35 = vmul.f32 %v3755_v30, %v2641_v29 }
 0xa00   : > { %v3759_v37 = vpop.eup %3758  ;;  %v2643_v18 = vmul.f32 %v3757_v33, %v2639_v31 }
 0xa01   : > { %v3761_v23 = vpop.eup %3760  ;;  %v2649_v51 = vadd.f32 %v2645_v35, %v2637_v34  ;;  %v2646_v52 = vmul.f32 %v3759_v37, %v2642_v36 }
 0xa02   : > { %v2647_v14 = vadd.f32 %v2643_v18, %v2635_v38  ;;  %v2644_v11 = vmul.f32 %v3761_v23, %v2640_v39 }
 0xa03   : > { %2653 = vst.msk [vmem:[#allocation2 + $0x30] sm:$0xff] %vm464_vm1, %v2649_v51  ;;  %v2650_v54 = vadd.f32 %v2646_v52, %v2638_v44 }
 0xa04   : > { %2651 = vst.msk [vmem:[#allocation2 + $0x20] sm:$0xff] %vm464_vm1, %v2647_v14  ;;  %v2648_v48 = vadd.f32 %v2644_v11, %v2636_v12 }
 0xa05   : > { %2654 = vst.msk [vmem:[#allocation2 + $0x38] sm:$0xff] %vm464_vm1, %v2650_v54 }
 0xa06   : > { %2652 = vst.msk [vmem:[#allocation2 + $0x28] sm:$0xff] %vm464_vm1, %v2648_v48 }
 0xa0a   : > { %v2657_v46 = vld [vmem:[#allocation2 + $0x30] sm:$0xff] }
 0xa0b   : > { %v2655_v55 = vld [vmem:[#allocation2 + $0x20] sm:$0xff]  ;;  %v2753_v6 = vld [vmem:[#allocation2 + $0x30] sm:$0xff] (!%p3074_p9) }
 0xa0c   : > { %v2658_v45 = vld [vmem:[#allocation2 + $0x38] sm:$0xff]  ;;  %v2751_v50 = vld [vmem:[#allocation2 + $0x20] sm:$0xff] (!%p3074_p9)  ;;  %2761 = vst.msk [vmem:[#allocation13 + $0x30] sm:$0xff] (!%p3074_p9), %vm464_vm1, %v2753_v6 }
 0xa0d   : > { %v2656_v49 = vld [vmem:[#allocation2 + $0x28] sm:$0xff]  ;;  %v2660_v57 = vpack.c.bf16 %v2658_v45, %v2657_v46  ;;  %2759 = vst.msk [vmem:[#allocation13 + $0x20] sm:$0xff] (!%p3074_p9), %vm464_vm1, %v2751_v50  ;;  %v2754_v41 = vld [vmem:[#allocation2 + $0x38] sm:$0xff] (!%p3074_p9) }
 0xa0e   : > { %v2659_v56 = vpack.c.bf16 %v2656_v49, %v2655_v55  ;;  %v2752_v40 = vld [vmem:[#allocation2 + $0x28] sm:$0xff] (!%p3074_p9)  ;;  %2762 = vst.msk [vmem:[#allocation13 + $0x38] sm:$0xff] (!%p3074_p9), %vm464_vm1, %v2754_v41 }
 0xa0f   : > { %2760 = vst.msk [vmem:[#allocation13 + $0x28] sm:$0xff] (!%p3074_p9), %vm464_vm1, %v2752_v40 }
 0xa10   : > { %3452 = vmatprep.mubr.msk.bf16.mxu0 %vm464_vm1, %v2659_v56 }
 0xa11   : > { %3453 = vmatmul.mubr.msk.bf16.vlgmr.msra.gmra.mrb[24].mxu0 %vm464_vm1, %v2660_v57 }
 0xae4   : > { %v3454_v59 = vpop.f32.mrb[24].mxu0  ;;  %2746 = sbr.rel (%p3074_p9) target bundleno = 2795 (0xaeb), region = 80 }
 0xae5   : > { %v2733_v60 = vadd.f32 %v3454_v59, %v3069_v58  ;;  %v2724_v61 = vpop.f32.mrb[25].mxu0 }
 0xae6   : > { %v2725_v53 = vadd.f32 %v3069_v58, %v2724_v61  ;;  %v3455_v62 = vpop.f32.mrb[26].mxu0 }
 0xae7   : > { %2741 = vst [vmem:[%s4298_s30 + $0x10] sm:$0xff] %v2733_v60  ;;  %v2736_v10 = vadd.f32 %v3455_v62, %v3069_v58  ;;  %v2727_v24 = vpop.f32.mrb[27].mxu0 }
 0xae8   : > { %2739 = vst [vmem:[%s4298_s30] sm:$0xff] %v2725_v53  ;;  %v2728_v63 = vadd.f32 %v3069_v58, %v2727_v24 }
 0xae9   : > { %2742 = vst [vmem:[%s4298_s30 + $0x18] sm:$0xff] %v2736_v10 }
 0xaea   : > { %2740 = vst [vmem:[%s4298_s30 + $0x8] sm:$0xff] %v2728_v63 }
 0xaeb PF: > { %s3083_s18 = sshll.u32 %s4094_s13, 9  ;;  %s4656_s14 = sld [smem:[#allocation22_spill]] }
 0xaec   : > { %s2777_s24 = sshll.u32 %s4298_s30, 4  ;;  %s2764_s9 = scalar_lea.sflag [#allocation5], %s4279_s20  ;;  %s4555_s24 = int_to_ptr.vmem [resolvable:$true] %s2777_s24 }
 0xaed   : > { %s3904_s25 = scalar_lea.vmem %s4555_s24, 512  ;;  %s4019_s26 = smov [#allocation12]  }
 0xaee   : > { %p3905_p12 = scmp.ne.s32.totalorder %s4555_s24, %s3904_s25  ;;  %s3908_s17 = sshll.u32 %s4019_s26, 4  ;;  %s3909_s17 = int_to_ptr.vmem [resolvable:$false] %s3908_s17 }
 0xaef   : > { %s3910_s15 = scalar_lea.vmem %s3909_s17, 1024  ;;  %p3911_p10 = scmp.lt.s32.totalorder %s4555_s24, %s3909_s17 }
 0xaf0   : > { %p3906_p3 = pnand %p3905_p12, %p4224_p6  ;;  %p3912_p13 = scmp.lt.s32.totalorder %s3910_s15, %s3904_s25 }
 0xaf1   : > { %s4552_s19 = scalar_lea.hbm %s4656_s14, %s3083_s18 }
 0xaf2   : > { %p3907_p7 = pneg %p3906_p3  ;;  %p3913_p0 = por %p3912_p13, %p3911_p10 }
 0xaf4   : > { %p3914_p5 = pnand %p3913_p0, %p3907_p7 }
 0xaf6   : > { %3917 = shalt.err (!%p3914_p5)
}
 0xaf7   : > { %s3918_s30 = scalar_lea.hbm %s4552_s19, 512  ;;  %s3922_s27 = scalar_lea.hbm %s4656_s14, 4096 }
 0xaf8   : > { %p3919_p11 = scmp.ne.s32.totalorder %s4552_s19, %s3918_s30  ;;  %p3923_p4 = scmp.lt.u32.totalorder %s4552_s19, %s4656_s14 }
 0xaf9   : > { %p3924_p8 = scmp.lt.u32.totalorder %s3922_s27, %s3918_s30  ;;  %p3926_p12 = scmp.lt.u32.totalorder %s3918_s30, %s4552_s19 }
 0xafa   : > { %p3920_p1 = pnand %p3919_p11, %p4224_p6 }
 0xafb   : > { %p3925_p9 = por %p3924_p8, %p3923_p4 }
 0xafc   : > { %p3921_p2 = pneg %p3920_p1 }
 0xafd   : > { %p3927_p3 = por %p3926_p12, %p3925_p9 }
 0xaff   : > { %p3928_p7 = pnand %p3927_p3, %p3921_p2 }
 0xb01   : > { %3931 = shalt.err (!%p3928_p7)
}
 0xb02   : > { %s4020_s23 = smov 128   ;;  %s4021_s25 = smov 8  }
 0xb03   : > { %3546 = dma.vmem_to_hbm [thread:$0]  (%p4224_p6), %s4555_s24, 512, %s4552_s19, %s2764_s9, %s4020_s23, %s4020_s23, %s4021_s25  }
 0xb04   : > { %s4022_s26 = smov [#allocation13]   ;;  %p4657_p13 = scmp.eq.s32.totalorder %s4094_s13, 7 }
 0xb05   : > { %s2790_s17 = sshll.u32 %s4022_s26, 4  ;;  %s2791_s17 = int_to_ptr.vmem [resolvable:$true] %s2790_s17 }
 0xb06   : > { %s3932_s15 = scalar_lea.vmem %s2791_s17, 1024  ;;  %p3939_p11 = scmp.lt.s32.totalorder %s2791_s17, %s2791_s17 }
 0xb07   : > { %p3933_p10 = scmp.ne.s32.totalorder %s2791_s17, %s3932_s15  ;;  %p3940_p1 = scmp.lt.s32.totalorder %s3932_s15, %s3932_s15 }
 0xb09   : > { %p3934_p0 = pnand %p3933_p10, %p4657_p13  ;;  %p3941_p2 = por %p3940_p1, %p3939_p11 }
 0xb0b   : > { %p3935_p5 = pneg %p3934_p0 }
 0xb0d   : > { %p3942_p4 = pnand %p3941_p2, %p3935_p5 }
 0xb0f   : > { %3945 = shalt.err (!%p3942_p4)
}
 0xb10   : > { %s4658_s29 = sld [smem:[#allocation23_spill]]  ;;  %p4659_p8 = pmov %p4657_p13 }
 0xb16   : > { %s3946_s8 = scalar_lea.hbm %s4658_s29, 1024 }
 0xb17   : > { %p3947_p6 = scmp.ne.s32.totalorder %s4658_s29, %s3946_s8  ;;  %p3952_p3 = scmp.lt.u32.totalorder %s3946_s8, %s4658_s29 }
 0xb19   : > { %p3948_p9 = pnand %p3947_p6, %p4659_p8 }
 0xb1b   : > { %p3949_p12 = pneg %p3948_p9 }
 0xb1d   : > { %p3954_p7 = pnand %p3952_p3, %p3949_p12 }
 0xb1f   : > { %3957 = shalt.err (!%p3954_p7)
}
 0xb20   : > { %p4660_p10 = pmov %p4659_p8  ;;  %p4661_p13 = pmov %p4659_p8 }
 0xb22   : > { %3548 = dma.vmem_to_hbm [thread:$0]  (%p4660_p10), %s2791_s17, 1024, %s4658_s29, [#allocation14], %s4020_s23, %s4020_s23, %s4021_s25  }
 0xb23   : > { %3987 = dma.done.wait (%p4661_p13), [#allocation14], 1024   ;;  %p4662_p0 = pmov %p4659_p8 }
 0xb25   : > { %3989 = vsyncadd (%p4662_p0), [#allocation14], 4294966272 }
 0xb26 PF: > { %s4663_s22 = sld [smem:[#allocation20_spill]]  ;;  %s4664_s26 = sld [smem:[#allocation21_spill]] }
 0xb27   : > { %p3584_p5 = scmp.ge.s32.totalorder %s4008_s12, 2 }
 0xb2c   : > { %s2809_s15 = sand.u32 1, %s4663_s22   ;;  %p4665_p11 = scmp.ne.s32.totalorder %s4664_s26, 0 }
 0xb2d   : > { %s2810_s30 = scalar_lea.sflag [#allocation5], %s2809_s15 }
 0xb2e   : > { %p3570_p1 = pnand %p3584_p5, %p4665_p11 }
 0xb30   : > { %3991 = dma.done.wait (!%p3570_p1), %s2810_s30, 512  }
 0xb31   : > { %3993 = vsyncadd (!%p3570_p1), %s2810_s30, 4294966784  ;;  %p26_p2 = scmp.ge.s32.totalorder %s4214_s28, 10   ;;  %s4666_s30 = smov %s4000_s10 }
 0xb32   : > { %s4667_s10 = smov %s4004_s11  ;;  %s4668_s11 = smov %s4230_s16 }
 0xb33   : > { %s4669_s12 = smov %s4214_s28  ;;  %28 = sbr.rel (!%p26_p2) target bundleno = 11 (0xb), region = 157 }
 0xb3a   :  { %2815 = vsyncpa [#allocation4], 1 }
 0xb3b   :  { %2817 = vsyncpa [#allocation4 + $0x1], 1 }
 0xb3c   :  { %2818 = vsyncpa [#allocation7], 1 }
 0xb3d   :  { %2819 = vsyncpa [#allocation10], 1 }
 0xb3e   :  { %2820 = vsyncpa [#allocation5], 1 }
 0xb3f   :  { %2822 = vsyncpa [#allocation5 + $0x1], 1 }
 0xb40   :  { %2823 = vsyncpa [#allocation14], 1 }

</bundles_post_ra>
